<compile_context>
chip_gen: v5e
topology: v5e:2x2
jax: 0.10.0
libtpu: 0.0.40
codegen_flags: <defaults>
</compile_context>

<pallas_src>
import functools

import jax
import jax.numpy as jnp
from jax.experimental import pallas as pl
from jax.experimental.pallas import tpu as pltpu

IN_DIM = 140
H_DIM = 256
OUT_DIM = 20

IN_PAD = 256    # layer-1 contraction dim padded to a clean MXU tile
OUT_PAD = 128   # output lane dim padded to a full vreg lane width


def _snn_kernel(x_ref, w1_ref, b1_ref, w2_ref, b2_ref, w3_ref, b3_ref,
                spk_ref, mem_ref, cur_buf, s1_buf, s2_buf,
                *, beta, threshold, T, Bp):
    H = H_DIM

    # ---- Phase 0: layer-1 current for ALL time steps in one 64-row MXU matmul ----
    x_all = x_ref[...].reshape(T * Bp, IN_PAD)                       # (T*Bp, 256)
    cur_buf[...] = jnp.dot(x_all, w1_ref[...],
                           preferred_element_type=jnp.float32) + b1_ref[...]

    # ---- Phase 1: layer-1 Leaky recurrence (pure VPU), spikes -> VMEM scratch ----
    # rst_t == spk_{t-1} (both are Heaviside(mem_{t-1} - threshold)), so carry the
    # previous spike instead of re-comparing the membrane.
    m1 = jnp.zeros((Bp, H), jnp.float32)
    s1 = jnp.zeros((Bp, H), jnp.float32)
    for t in range(T):
        cur1 = cur_buf[pl.ds(t * Bp, Bp), :]
        m1 = beta * m1 + cur1 - s1 * threshold
        s1 = (m1 > threshold).astype(jnp.float32)
        s1_buf[pl.ds(t * Bp, Bp), :] = s1

    # ---- Phase 2: layer-2 current batched, then layer-2 recurrence ----
    cur_buf[...] = jnp.dot(s1_buf[...], w2_ref[...],
                           preferred_element_type=jnp.float32) + b2_ref[...]

    m2 = jnp.zeros((Bp, H), jnp.float32)
    s2 = jnp.zeros((Bp, H), jnp.float32)
    for t in range(T):
        cur2 = cur_buf[pl.ds(t * Bp, Bp), :]
        m2 = beta * m2 + cur2 - s2 * threshold
        s2 = (m2 > threshold).astype(jnp.float32)
        s2_buf[pl.ds(t * Bp, Bp), :] = s2

    # ---- Phase 3: layer-3 current batched, final recurrence + lane-dense stores ----
    cur3_all = jnp.dot(s2_buf[...], w3_ref[...],
                       preferred_element_type=jnp.float32) + b3_ref[...]   # (T*Bp, 128)

    m3 = jnp.zeros((Bp, OUT_PAD), jnp.float32)
    s3 = jnp.zeros((Bp, OUT_PAD), jnp.float32)
    for t in range(T):
        cur3 = cur3_all[t * Bp:(t + 1) * Bp, :]
        m3 = beta * m3 + cur3 - s3 * threshold
        s3 = (m3 > threshold).astype(jnp.float32)
        # (Bp, 128) lane-dense stores; the whole (T, Bp, 128) block is DMA'd
        # back to HBM once at the end of the single grid step.
        spk_ref[t] = s3
        mem_ref[t] = m3


def prepare_params(params):
    """Pad weights once at init time (hoisted out of the per-call path).

    Input params are nn.Linear-equivalent, stored as (in, out) + (1, out).
    Zero rows in W1 (padded K) and zero cols in W3/b3 (padded lanes) are exact no-ops.
    """
    w1, b1, w2, b2, w3, b3 = params
    w1p = jnp.pad(w1, ((0, IN_PAD - w1.shape[0]), (0, 0)))
    w3p = jnp.pad(w3, ((0, 0), (0, OUT_PAD - OUT_DIM)))
    b3p = jnp.pad(b3, ((0, 0), (0, OUT_PAD - OUT_DIM)))
    return (w1p, b1, w2, b2, w3p, b3p)


def snn_forward(data_tbf, padded_params, *, beta, threshold):
    """data_tbf: (T, B, 140) float32. Returns (spk_rec, mem_rec), each (T, B, 20)."""
    T, B, F = data_tbf.shape
    w1p, b1, w2, b2, w3p, b3p = padded_params
    beta = float(min(max(beta, 0.0), 1.0))   # snntorch clamps beta to [0,1] in forward
    threshold = float(threshold)

    # Pad batch to a multiple of 8 sublanes; zero rows evolve from bias only
    # (no cross-batch mixing) and are sliced away below.
    Bp = max(8, ((B + 7) // 8) * 8)
    x = jnp.pad(data_tbf, ((0, 0), (0, Bp - B), (0, IN_PAD - F)))

    kernel = functools.partial(_snn_kernel, beta=beta, threshold=threshold, T=T, Bp=Bp)

    full3 = lambda s: pl.BlockSpec(s, lambda i: (0, 0, 0))
    full2 = lambda s: pl.BlockSpec(s, lambda i: (0, 0))

    grid_spec = pltpu.PrefetchScalarGridSpec(
        num_scalar_prefetch=0,
        grid=(1,),                                   # whole recurrence in one grid step
        in_specs=[
            full3((T, Bp, IN_PAD)),                  # all time steps of the input
            full2((IN_PAD, H_DIM)),                  # W1 (K-padded, resident)
            full2((1, H_DIM)),                       # b1
            full2((H_DIM, H_DIM)),                   # W2
            full2((1, H_DIM)),                       # b2
            full2((H_DIM, OUT_PAD)),                 # W3 (lane-padded)
            full2((1, OUT_PAD)),                     # b3
        ],
        out_specs=[
            full3((T, Bp, OUT_PAD)),                 # spk_rec (lane-dense)
            full3((T, Bp, OUT_PAD)),                 # mem_rec (lane-dense)
        ],
        scratch_shapes=[
            pltpu.VMEM((T * Bp, H_DIM), jnp.float32),   # cur slab (reused layer1/2)
            pltpu.VMEM((T * Bp, H_DIM), jnp.float32),   # S1_all
            pltpu.VMEM((T * Bp, H_DIM), jnp.float32),   # S2_all
        ],
    )

    spk_p, mem_p = pl.pallas_call(
        kernel,
        out_shape=(
            jax.ShapeDtypeStruct((T, Bp, OUT_PAD), jnp.float32),
            jax.ShapeDtypeStruct((T, Bp, OUT_PAD), jnp.float32),
        ),
        grid_spec=grid_spec,
        compiler_params=pltpu.CompilerParams(
            dimension_semantics=("arbitrary",),
        ),
    )(x, w1p, b1, w2, b2, w3p, b3p)

    # TODO(synk): on v7x, once batch >> 8, add a leading batch grid axis with
    # dimension_semantics=("parallel", "arbitrary") so both TensorCores split the
    # batch; at B=2 there is nothing to split.
    return spk_p[:, :B, :OUT_DIM], mem_p[:, :B, :OUT_DIM]


def _init_params(key):
    """Deterministic nn.Linear-style init: U(-1/sqrt(fan_in), 1/sqrt(fan_in))."""
    ks = jax.random.split(key, 6)

    def lin(kw, kb, fan_in, fan_out):
        bound = 1.0 / (fan_in ** 0.5)
        # stored as (in, out) so the kernel computes x @ W (== x @ W_torch.T)
        w = jax.random.uniform(kw, (fan_in, fan_out), jnp.float32, -bound, bound)
        b = jax.random.uniform(kb, (1, fan_out), jnp.float32, -bound, bound)
        return w, b

    w1, b1 = lin(ks[0], ks[1], IN_DIM, H_DIM)
    w2, b2 = lin(ks[2], ks[3], H_DIM, H_DIM)
    w3, b3 = lin(ks[4], ks[5], H_DIM, OUT_DIM)
    return (w1, b1, w2, b2, w3, b3)


def _reference(data_tbf, params, beta, threshold):
    """Pure-JAX reference of the same recurrence (for correctness check)."""
    w1, b1, w2, b2, w3, b3 = params
    T, B, _ = data_tbf.shape
    m1 = jnp.zeros((B, H_DIM), jnp.float32)
    m2 = jnp.zeros((B, H_DIM), jnp.float32)
    m3 = jnp.zeros((B, OUT_DIM), jnp.float32)
    spk_rec, mem_rec = [], []
    for t in range(T):
        x = data_tbf[t]
        cur1 = x @ w1 + b1
        m1 = beta * m1 + cur1 - (m1 > threshold).astype(jnp.float32) * threshold
        s1 = (m1 > threshold).astype(jnp.float32)
        cur2 = s1 @ w2 + b2
        m2 = beta * m2 + cur2 - (m2 > threshold).astype(jnp.float32) * threshold
        s2 = (m2 > threshold).astype(jnp.float32)
        cur3 = s2 @ w3 + b3
        m3 = beta * m3 + cur3 - (m3 > threshold).astype(jnp.float32) * threshold
        s3 = (m3 > threshold).astype(jnp.float32)
        spk_rec.append(s3)
        mem_rec.append(m3)
    return jnp.stack(spk_rec), jnp.stack(mem_rec)


if __name__ == "__main__":
    beta = 0.9
    threshold = 1.0
    T, B = 8, 2  # time_steps=8, batch=2

    key = jax.random.PRNGKey(0)
    k_param, k_data = jax.random.split(key)
    params = _init_params(k_param)
    padded_params = prepare_params(params)   # padded once, reused every call

    # PyTorch input is (B, T, 140); kernel layout is time-major (T, B, 140).
    data_btf = jax.random.normal(k_data, (B, T, IN_DIM), jnp.float32)
    data_tbf = jnp.transpose(data_btf, (1, 0, 2))

    spk_rec, mem_rec = snn_forward(data_tbf, padded_params,
                                   beta=beta, threshold=threshold)
    jax.block_until_ready((spk_rec, mem_rec))

    ref_spk, ref_mem = _reference(data_tbf, params, beta, threshold)
    assert spk_rec.shape == (T, B, OUT_DIM) and mem_rec.shape == (T, B, OUT_DIM)
    assert jnp.allclose(spk_rec, ref_spk), "spike mismatch"
    assert jnp.allclose(mem_rec, ref_mem, atol=1e-5), "membrane mismatch"

    print("KERNEL_OK")
</pallas_src>

<mosaic_0001>
module attributes {stable_mosaic.version = 11 : i64} {
  func.func @_snn_kernel(%arg0: i32, %arg1: memref<8x8x256xf32, #tpu.memory_space<vmem>>, %arg2: memref<256x256xf32, #tpu.memory_space<vmem>>, %arg3: memref<1x256xf32, #tpu.memory_space<vmem>>, %arg4: memref<256x256xf32, #tpu.memory_space<vmem>>, %arg5: memref<1x256xf32, #tpu.memory_space<vmem>>, %arg6: memref<256x128xf32, #tpu.memory_space<vmem>>, %arg7: memref<1x128xf32, #tpu.memory_space<vmem>>, %arg8: memref<8x8x128xf32, #tpu.memory_space<vmem>>, %arg9: memref<8x8x128xf32, #tpu.memory_space<vmem>>, %arg10: memref<64x256xf32, #tpu.memory_space<vmem>>, %arg11: memref<64x256xf32, #tpu.memory_space<vmem>>, %arg12: memref<64x256xf32, #tpu.memory_space<vmem>>) attributes {dimension_semantics = [#tpu.dimension_semantics<arbitrary>], iteration_bounds = array<i64: 1>, scalar_prefetch = 0 : i64, scratch_operands = 3 : i64, tpu.core_type = #tpu.core_type<tc>, window_params = [{pipeline_mode = #tpu.pipeline_mode<synchronous>, transform_indices = @transform_0, window_bounds = array<i64: 8, 8, 256>}, {pipeline_mode = #tpu.pipeline_mode<synchronous>, transform_indices = @transform_1, window_bounds = array<i64: 256, 256>}, {pipeline_mode = #tpu.pipeline_mode<synchronous>, transform_indices = @transform_2, window_bounds = array<i64: 1, 256>}, {pipeline_mode = #tpu.pipeline_mode<synchronous>, transform_indices = @transform_3, window_bounds = array<i64: 256, 256>}, {pipeline_mode = #tpu.pipeline_mode<synchronous>, transform_indices = @transform_4, window_bounds = array<i64: 1, 256>}, {pipeline_mode = #tpu.pipeline_mode<synchronous>, transform_indices = @transform_5, window_bounds = array<i64: 256, 128>}, {pipeline_mode = #tpu.pipeline_mode<synchronous>, transform_indices = @transform_6, window_bounds = array<i64: 1, 128>}, {pipeline_mode = #tpu.pipeline_mode<synchronous>, transform_indices = @transform_7, window_bounds = array<i64: 8, 8, 128>}, {pipeline_mode = #tpu.pipeline_mode<synchronous>, transform_indices = @transform_8, window_bounds = array<i64: 8, 8, 128>}]} {
    %c0 = arith.constant 0 : index
    %c0_0 = arith.constant 0 : index
    %c0_1 = arith.constant 0 : index
    %0 = vector.load %arg1[%c0, %c0_0, %c0_1] : memref<8x8x256xf32, #tpu.memory_space<vmem>>, vector<8x8x256xf32>
    %1 = vector.shape_cast %0 : vector<8x8x256xf32> to vector<64x256xf32>
    %c0_2 = arith.constant 0 : index
    %c0_3 = arith.constant 0 : index
    %2 = vector.load %arg2[%c0_2, %c0_3] : memref<256x256xf32, #tpu.memory_space<vmem>>, vector<256x256xf32>
    %cst = arith.constant dense<0.000000e+00> : vector<64x256xf32>
    %3 = tpu.matmul %1, %2, %cst {dimension_numbers = #tpu.dot_dimension_numbers<[1], [0], [0], [1], [0, 0, 1, 1], [], []>} : vector<64x256xf32>, vector<256x256xf32>, vector<64x256xf32> -> vector<64x256xf32>
    %c0_4 = arith.constant 0 : index
    %c0_5 = arith.constant 0 : index
    %4 = vector.load %arg3[%c0_4, %c0_5] : memref<1x256xf32, #tpu.memory_space<vmem>>, vector<1x256xf32>
    %5 = vector.broadcast %4 : vector<1x256xf32> to vector<64x256xf32>
    %6 = arith.addf %3, %5 : vector<64x256xf32>
    %c0_6 = arith.constant 0 : index
    %c0_7 = arith.constant 0 : index
    %7 = vector.load %arg10[%c0_6, %c0_7] : memref<64x256xf32, #tpu.memory_space<vmem>>, vector<64x256xf32>
    tpu.vector_store %arg10[%c0_6, %c0_7], %6 {strides = array<i32>} : memref<64x256xf32, #tpu.memory_space<vmem>>, vector<64x256xf32>,
    %cst_8 = arith.constant 0.000000e+00 : f32
    %8 = vector.broadcast %cst_8 : f32 to vector<8x256xf32>
    %cst_9 = arith.constant 0.000000e+00 : f32
    %9 = vector.broadcast %cst_9 : f32 to vector<8x256xf32>
    %c0_10 = arith.constant 0 : index
    %c0_11 = arith.constant 0 : index
    %10 = vector.load %arg10[%c0_10, %c0_11] : memref<64x256xf32, #tpu.memory_space<vmem>>, vector<8x256xf32>
    %cst_12 = arith.constant 0.899999976 : f32
    %11 = vector.broadcast %cst_12 : f32 to vector<8x256xf32>
    %12 = arith.mulf %11, %8 : vector<8x256xf32>
    %13 = arith.addf %12, %10 : vector<8x256xf32>
    %cst_13 = arith.constant 1.000000e+00 : f32
    %14 = vector.broadcast %cst_13 : f32 to vector<8x256xf32>
    %15 = arith.mulf %9, %14 : vector<8x256xf32>
    %16 = arith.subf %13, %15 : vector<8x256xf32>
    %cst_14 = arith.constant 1.000000e+00 : f32
    %17 = vector.broadcast %cst_14 : f32 to vector<8x256xf32>
    %18 = arith.cmpf ogt, %16, %17 : vector<8x256xf32>
    %19 = arith.extui %18 : vector<8x256xi1> to vector<8x256xi32>
    %20 = arith.sitofp %19 : vector<8x256xi32> to vector<8x256xf32>
    %c0_15 = arith.constant 0 : index
    %c0_16 = arith.constant 0 : index
    %21 = vector.load %arg11[%c0_15, %c0_16] : memref<64x256xf32, #tpu.memory_space<vmem>>, vector<8x256xf32>
    tpu.vector_store %arg11[%c0_15, %c0_16], %20 {strides = array<i32>} : memref<64x256xf32, #tpu.memory_space<vmem>>, vector<8x256xf32>,
    %c8 = arith.constant 8 : index
    %c0_17 = arith.constant 0 : index
    %22 = vector.load %arg10[%c8, %c0_17] : memref<64x256xf32, #tpu.memory_space<vmem>>, vector<8x256xf32>
    %cst_18 = arith.constant 0.899999976 : f32
    %23 = vector.broadcast %cst_18 : f32 to vector<8x256xf32>
    %24 = arith.mulf %23, %16 : vector<8x256xf32>
    %25 = arith.addf %24, %22 : vector<8x256xf32>
    %cst_19 = arith.constant 1.000000e+00 : f32
    %26 = vector.broadcast %cst_19 : f32 to vector<8x256xf32>
    %27 = arith.mulf %20, %26 : vector<8x256xf32>
    %28 = arith.subf %25, %27 : vector<8x256xf32>
    %cst_20 = arith.constant 1.000000e+00 : f32
    %29 = vector.broadcast %cst_20 : f32 to vector<8x256xf32>
    %30 = arith.cmpf ogt, %28, %29 : vector<8x256xf32>
    %31 = arith.extui %30 : vector<8x256xi1> to vector<8x256xi32>
    %32 = arith.sitofp %31 : vector<8x256xi32> to vector<8x256xf32>
    %c8_21 = arith.constant 8 : index
    %c0_22 = arith.constant 0 : index
    %33 = vector.load %arg11[%c8_21, %c0_22] : memref<64x256xf32, #tpu.memory_space<vmem>>, vector<8x256xf32>
    tpu.vector_store %arg11[%c8_21, %c0_22], %32 {strides = array<i32>} : memref<64x256xf32, #tpu.memory_space<vmem>>, vector<8x256xf32>,
    %c16 = arith.constant 16 : index
    %c0_23 = arith.constant 0 : index
    %34 = vector.load %arg10[%c16, %c0_23] : memref<64x256xf32, #tpu.memory_space<vmem>>, vector<8x256xf32>
    %cst_24 = arith.constant 0.899999976 : f32
    %35 = vector.broadcast %cst_24 : f32 to vector<8x256xf32>
    %36 = arith.mulf %35, %28 : vector<8x256xf32>
    %37 = arith.addf %36, %34 : vector<8x256xf32>
    %cst_25 = arith.constant 1.000000e+00 : f32
    %38 = vector.broadcast %cst_25 : f32 to vector<8x256xf32>
    %39 = arith.mulf %32, %38 : vector<8x256xf32>
    %40 = arith.subf %37, %39 : vector<8x256xf32>
    %cst_26 = arith.constant 1.000000e+00 : f32
    %41 = vector.broadcast %cst_26 : f32 to vector<8x256xf32>
    %42 = arith.cmpf ogt, %40, %41 : vector<8x256xf32>
    %43 = arith.extui %42 : vector<8x256xi1> to vector<8x256xi32>
    %44 = arith.sitofp %43 : vector<8x256xi32> to vector<8x256xf32>
    %c16_27 = arith.constant 16 : index
    %c0_28 = arith.constant 0 : index
    %45 = vector.load %arg11[%c16_27, %c0_28] : memref<64x256xf32, #tpu.memory_space<vmem>>, vector<8x256xf32>
    tpu.vector_store %arg11[%c16_27, %c0_28], %44 {strides = array<i32>} : memref<64x256xf32, #tpu.memory_space<vmem>>, vector<8x256xf32>,
    %c24 = arith.constant 24 : index
    %c0_29 = arith.constant 0 : index
    %46 = vector.load %arg10[%c24, %c0_29] : memref<64x256xf32, #tpu.memory_space<vmem>>, vector<8x256xf32>
    %cst_30 = arith.constant 0.899999976 : f32
    %47 = vector.broadcast %cst_30 : f32 to vector<8x256xf32>
    %48 = arith.mulf %47, %40 : vector<8x256xf32>
    %49 = arith.addf %48, %46 : vector<8x256xf32>
    %cst_31 = arith.constant 1.000000e+00 : f32
    %50 = vector.broadcast %cst_31 : f32 to vector<8x256xf32>
    %51 = arith.mulf %44, %50 : vector<8x256xf32>
    %52 = arith.subf %49, %51 : vector<8x256xf32>
    %cst_32 = arith.constant 1.000000e+00 : f32
    %53 = vector.broadcast %cst_32 : f32 to vector<8x256xf32>
    %54 = arith.cmpf ogt, %52, %53 : vector<8x256xf32>
    %55 = arith.extui %54 : vector<8x256xi1> to vector<8x256xi32>
    %56 = arith.sitofp %55 : vector<8x256xi32> to vector<8x256xf32>
    %c24_33 = arith.constant 24 : index
    %c0_34 = arith.constant 0 : index
    %57 = vector.load %arg11[%c24_33, %c0_34] : memref<64x256xf32, #tpu.memory_space<vmem>>, vector<8x256xf32>
    tpu.vector_store %arg11[%c24_33, %c0_34], %56 {strides = array<i32>} : memref<64x256xf32, #tpu.memory_space<vmem>>, vector<8x256xf32>,
    %c32 = arith.constant 32 : index
    %c0_35 = arith.constant 0 : index
    %58 = vector.load %arg10[%c32, %c0_35] : memref<64x256xf32, #tpu.memory_space<vmem>>, vector<8x256xf32>
    %cst_36 = arith.constant 0.899999976 : f32
    %59 = vector.broadcast %cst_36 : f32 to vector<8x256xf32>
    %60 = arith.mulf %59, %52 : vector<8x256xf32>
    %61 = arith.addf %60, %58 : vector<8x256xf32>
    %cst_37 = arith.constant 1.000000e+00 : f32
    %62 = vector.broadcast %cst_37 : f32 to vector<8x256xf32>
    %63 = arith.mulf %56, %62 : vector<8x256xf32>
    %64 = arith.subf %61, %63 : vector<8x256xf32>
    %cst_38 = arith.constant 1.000000e+00 : f32
    %65 = vector.broadcast %cst_38 : f32 to vector<8x256xf32>
    %66 = arith.cmpf ogt, %64, %65 : vector<8x256xf32>
    %67 = arith.extui %66 : vector<8x256xi1> to vector<8x256xi32>
    %68 = arith.sitofp %67 : vector<8x256xi32> to vector<8x256xf32>
    %c32_39 = arith.constant 32 : index
    %c0_40 = arith.constant 0 : index
    %69 = vector.load %arg11[%c32_39, %c0_40] : memref<64x256xf32, #tpu.memory_space<vmem>>, vector<8x256xf32>
    tpu.vector_store %arg11[%c32_39, %c0_40], %68 {strides = array<i32>} : memref<64x256xf32, #tpu.memory_space<vmem>>, vector<8x256xf32>,
    %c40 = arith.constant 40 : index
    %c0_41 = arith.constant 0 : index
    %70 = vector.load %arg10[%c40, %c0_41] : memref<64x256xf32, #tpu.memory_space<vmem>>, vector<8x256xf32>
    %cst_42 = arith.constant 0.899999976 : f32
    %71 = vector.broadcast %cst_42 : f32 to vector<8x256xf32>
    %72 = arith.mulf %71, %64 : vector<8x256xf32>
    %73 = arith.addf %72, %70 : vector<8x256xf32>
    %cst_43 = arith.constant 1.000000e+00 : f32
    %74 = vector.broadcast %cst_43 : f32 to vector<8x256xf32>
    %75 = arith.mulf %68, %74 : vector<8x256xf32>
    %76 = arith.subf %73, %75 : vector<8x256xf32>
    %cst_44 = arith.constant 1.000000e+00 : f32
    %77 = vector.broadcast %cst_44 : f32 to vector<8x256xf32>
    %78 = arith.cmpf ogt, %76, %77 : vector<8x256xf32>
    %79 = arith.extui %78 : vector<8x256xi1> to vector<8x256xi32>
    %80 = arith.sitofp %79 : vector<8x256xi32> to vector<8x256xf32>
    %c40_45 = arith.constant 40 : index
    %c0_46 = arith.constant 0 : index
    %81 = vector.load %arg11[%c40_45, %c0_46] : memref<64x256xf32, #tpu.memory_space<vmem>>, vector<8x256xf32>
    tpu.vector_store %arg11[%c40_45, %c0_46], %80 {strides = array<i32>} : memref<64x256xf32, #tpu.memory_space<vmem>>, vector<8x256xf32>,
    %c48 = arith.constant 48 : index
    %c0_47 = arith.constant 0 : index
    %82 = vector.load %arg10[%c48, %c0_47] : memref<64x256xf32, #tpu.memory_space<vmem>>, vector<8x256xf32>
    %cst_48 = arith.constant 0.899999976 : f32
    %83 = vector.broadcast %cst_48 : f32 to vector<8x256xf32>
    %84 = arith.mulf %83, %76 : vector<8x256xf32>
    %85 = arith.addf %84, %82 : vector<8x256xf32>
    %cst_49 = arith.constant 1.000000e+00 : f32
    %86 = vector.broadcast %cst_49 : f32 to vector<8x256xf32>
    %87 = arith.mulf %80, %86 : vector<8x256xf32>
    %88 = arith.subf %85, %87 : vector<8x256xf32>
    %cst_50 = arith.constant 1.000000e+00 : f32
    %89 = vector.broadcast %cst_50 : f32 to vector<8x256xf32>
    %90 = arith.cmpf ogt, %88, %89 : vector<8x256xf32>
    %91 = arith.extui %90 : vector<8x256xi1> to vector<8x256xi32>
    %92 = arith.sitofp %91 : vector<8x256xi32> to vector<8x256xf32>
    %c48_51 = arith.constant 48 : index
    %c0_52 = arith.constant 0 : index
    %93 = vector.load %arg11[%c48_51, %c0_52] : memref<64x256xf32, #tpu.memory_space<vmem>>, vector<8x256xf32>
    tpu.vector_store %arg11[%c48_51, %c0_52], %92 {strides = array<i32>} : memref<64x256xf32, #tpu.memory_space<vmem>>, vector<8x256xf32>,
    %c56 = arith.constant 56 : index
    %c0_53 = arith.constant 0 : index
    %94 = vector.load %arg10[%c56, %c0_53] : memref<64x256xf32, #tpu.memory_space<vmem>>, vector<8x256xf32>
    %cst_54 = arith.constant 0.899999976 : f32
    %95 = vector.broadcast %cst_54 : f32 to vector<8x256xf32>
    %96 = arith.mulf %95, %88 : vector<8x256xf32>
    %97 = arith.addf %96, %94 : vector<8x256xf32>
    %cst_55 = arith.constant 1.000000e+00 : f32
    %98 = vector.broadcast %cst_55 : f32 to vector<8x256xf32>
    %99 = arith.mulf %92, %98 : vector<8x256xf32>
    %100 = arith.subf %97, %99 : vector<8x256xf32>
    %cst_56 = arith.constant 1.000000e+00 : f32
    %101 = vector.broadcast %cst_56 : f32 to vector<8x256xf32>
    %102 = arith.cmpf ogt, %100, %101 : vector<8x256xf32>
    %103 = arith.extui %102 : vector<8x256xi1> to vector<8x256xi32>
    %104 = arith.sitofp %103 : vector<8x256xi32> to vector<8x256xf32>
    %c56_57 = arith.constant 56 : index
    %c0_58 = arith.constant 0 : index
    %105 = vector.load %arg11[%c56_57, %c0_58] : memref<64x256xf32, #tpu.memory_space<vmem>>, vector<8x256xf32>
    tpu.vector_store %arg11[%c56_57, %c0_58], %104 {strides = array<i32>} : memref<64x256xf32, #tpu.memory_space<vmem>>, vector<8x256xf32>,
    %c0_59 = arith.constant 0 : index
    %c0_60 = arith.constant 0 : index
    %106 = vector.load %arg11[%c0_59, %c0_60] : memref<64x256xf32, #tpu.memory_space<vmem>>, vector<64x256xf32>
    %c0_61 = arith.constant 0 : index
    %c0_62 = arith.constant 0 : index
    %107 = vector.load %arg4[%c0_61, %c0_62] : memref<256x256xf32, #tpu.memory_space<vmem>>, vector<256x256xf32>
    %cst_63 = arith.constant dense<0.000000e+00> : vector<64x256xf32>
    %108 = tpu.matmul %106, %107, %cst_63 {dimension_numbers = #tpu.dot_dimension_numbers<[1], [0], [0], [1], [0, 0, 1, 1], [], []>} : vector<64x256xf32>, vector<256x256xf32>, vector<64x256xf32> -> vector<64x256xf32>
    %c0_64 = arith.constant 0 : index
    %c0_65 = arith.constant 0 : index
    %109 = vector.load %arg5[%c0_64, %c0_65] : memref<1x256xf32, #tpu.memory_space<vmem>>, vector<1x256xf32>
    %110 = vector.broadcast %109 : vector<1x256xf32> to vector<64x256xf32>
    %111 = arith.addf %108, %110 : vector<64x256xf32>
    %c0_66 = arith.constant 0 : index
    %c0_67 = arith.constant 0 : index
    %112 = vector.load %arg10[%c0_66, %c0_67] : memref<64x256xf32, #tpu.memory_space<vmem>>, vector<64x256xf32>
    tpu.vector_store %arg10[%c0_66, %c0_67], %111 {strides = array<i32>} : memref<64x256xf32, #tpu.memory_space<vmem>>, vector<64x256xf32>,
    %cst_68 = arith.constant 0.000000e+00 : f32
    %113 = vector.broadcast %cst_68 : f32 to vector<8x256xf32>
    %cst_69 = arith.constant 0.000000e+00 : f32
    %114 = vector.broadcast %cst_69 : f32 to vector<8x256xf32>
    %c0_70 = arith.constant 0 : index
    %c0_71 = arith.constant 0 : index
    %115 = vector.load %arg10[%c0_70, %c0_71] : memref<64x256xf32, #tpu.memory_space<vmem>>, vector<8x256xf32>
    %cst_72 = arith.constant 0.899999976 : f32
    %116 = vector.broadcast %cst_72 : f32 to vector<8x256xf32>
    %117 = arith.mulf %116, %113 : vector<8x256xf32>
    %118 = arith.addf %117, %115 : vector<8x256xf32>
    %cst_73 = arith.constant 1.000000e+00 : f32
    %119 = vector.broadcast %cst_73 : f32 to vector<8x256xf32>
    %120 = arith.mulf %114, %119 : vector<8x256xf32>
    %121 = arith.subf %118, %120 : vector<8x256xf32>
    %cst_74 = arith.constant 1.000000e+00 : f32
    %122 = vector.broadcast %cst_74 : f32 to vector<8x256xf32>
    %123 = arith.cmpf ogt, %121, %122 : vector<8x256xf32>
    %124 = arith.extui %123 : vector<8x256xi1> to vector<8x256xi32>
    %125 = arith.sitofp %124 : vector<8x256xi32> to vector<8x256xf32>
    %c0_75 = arith.constant 0 : index
    %c0_76 = arith.constant 0 : index
    %126 = vector.load %arg12[%c0_75, %c0_76] : memref<64x256xf32, #tpu.memory_space<vmem>>, vector<8x256xf32>
    tpu.vector_store %arg12[%c0_75, %c0_76], %125 {strides = array<i32>} : memref<64x256xf32, #tpu.memory_space<vmem>>, vector<8x256xf32>,
    %c8_77 = arith.constant 8 : index
    %c0_78 = arith.constant 0 : index
    %127 = vector.load %arg10[%c8_77, %c0_78] : memref<64x256xf32, #tpu.memory_space<vmem>>, vector<8x256xf32>
    %cst_79 = arith.constant 0.899999976 : f32
    %128 = vector.broadcast %cst_79 : f32 to vector<8x256xf32>
    %129 = arith.mulf %128, %121 : vector<8x256xf32>
    %130 = arith.addf %129, %127 : vector<8x256xf32>
    %cst_80 = arith.constant 1.000000e+00 : f32
    %131 = vector.broadcast %cst_80 : f32 to vector<8x256xf32>
    %132 = arith.mulf %125, %131 : vector<8x256xf32>
    %133 = arith.subf %130, %132 : vector<8x256xf32>
    %cst_81 = arith.constant 1.000000e+00 : f32
    %134 = vector.broadcast %cst_81 : f32 to vector<8x256xf32>
    %135 = arith.cmpf ogt, %133, %134 : vector<8x256xf32>
    %136 = arith.extui %135 : vector<8x256xi1> to vector<8x256xi32>
    %137 = arith.sitofp %136 : vector<8x256xi32> to vector<8x256xf32>
    %c8_82 = arith.constant 8 : index
    %c0_83 = arith.constant 0 : index
    %138 = vector.load %arg12[%c8_82, %c0_83] : memref<64x256xf32, #tpu.memory_space<vmem>>, vector<8x256xf32>
    tpu.vector_store %arg12[%c8_82, %c0_83], %137 {strides = array<i32>} : memref<64x256xf32, #tpu.memory_space<vmem>>, vector<8x256xf32>,
    %c16_84 = arith.constant 16 : index
    %c0_85 = arith.constant 0 : index
    %139 = vector.load %arg10[%c16_84, %c0_85] : memref<64x256xf32, #tpu.memory_space<vmem>>, vector<8x256xf32>
    %cst_86 = arith.constant 0.899999976 : f32
    %140 = vector.broadcast %cst_86 : f32 to vector<8x256xf32>
    %141 = arith.mulf %140, %133 : vector<8x256xf32>
    %142 = arith.addf %141, %139 : vector<8x256xf32>
    %cst_87 = arith.constant 1.000000e+00 : f32
    %143 = vector.broadcast %cst_87 : f32 to vector<8x256xf32>
    %144 = arith.mulf %137, %143 : vector<8x256xf32>
    %145 = arith.subf %142, %144 : vector<8x256xf32>
    %cst_88 = arith.constant 1.000000e+00 : f32
    %146 = vector.broadcast %cst_88 : f32 to vector<8x256xf32>
    %147 = arith.cmpf ogt, %145, %146 : vector<8x256xf32>
    %148 = arith.extui %147 : vector<8x256xi1> to vector<8x256xi32>
    %149 = arith.sitofp %148 : vector<8x256xi32> to vector<8x256xf32>
    %c16_89 = arith.constant 16 : index
    %c0_90 = arith.constant 0 : index
    %150 = vector.load %arg12[%c16_89, %c0_90] : memref<64x256xf32, #tpu.memory_space<vmem>>, vector<8x256xf32>
    tpu.vector_store %arg12[%c16_89, %c0_90], %149 {strides = array<i32>} : memref<64x256xf32, #tpu.memory_space<vmem>>, vector<8x256xf32>,
    %c24_91 = arith.constant 24 : index
    %c0_92 = arith.constant 0 : index
    %151 = vector.load %arg10[%c24_91, %c0_92] : memref<64x256xf32, #tpu.memory_space<vmem>>, vector<8x256xf32>
    %cst_93 = arith.constant 0.899999976 : f32
    %152 = vector.broadcast %cst_93 : f32 to vector<8x256xf32>
    %153 = arith.mulf %152, %145 : vector<8x256xf32>
    %154 = arith.addf %153, %151 : vector<8x256xf32>
    %cst_94 = arith.constant 1.000000e+00 : f32
    %155 = vector.broadcast %cst_94 : f32 to vector<8x256xf32>
    %156 = arith.mulf %149, %155 : vector<8x256xf32>
    %157 = arith.subf %154, %156 : vector<8x256xf32>
    %cst_95 = arith.constant 1.000000e+00 : f32
    %158 = vector.broadcast %cst_95 : f32 to vector<8x256xf32>
    %159 = arith.cmpf ogt, %157, %158 : vector<8x256xf32>
    %160 = arith.extui %159 : vector<8x256xi1> to vector<8x256xi32>
    %161 = arith.sitofp %160 : vector<8x256xi32> to vector<8x256xf32>
    %c24_96 = arith.constant 24 : index
    %c0_97 = arith.constant 0 : index
    %162 = vector.load %arg12[%c24_96, %c0_97] : memref<64x256xf32, #tpu.memory_space<vmem>>, vector<8x256xf32>
    tpu.vector_store %arg12[%c24_96, %c0_97], %161 {strides = array<i32>} : memref<64x256xf32, #tpu.memory_space<vmem>>, vector<8x256xf32>,
    %c32_98 = arith.constant 32 : index
    %c0_99 = arith.constant 0 : index
    %163 = vector.load %arg10[%c32_98, %c0_99] : memref<64x256xf32, #tpu.memory_space<vmem>>, vector<8x256xf32>
    %cst_100 = arith.constant 0.899999976 : f32
    %164 = vector.broadcast %cst_100 : f32 to vector<8x256xf32>
    %165 = arith.mulf %164, %157 : vector<8x256xf32>
    %166 = arith.addf %165, %163 : vector<8x256xf32>
    %cst_101 = arith.constant 1.000000e+00 : f32
    %167 = vector.broadcast %cst_101 : f32 to vector<8x256xf32>
    %168 = arith.mulf %161, %167 : vector<8x256xf32>
    %169 = arith.subf %166, %168 : vector<8x256xf32>
    %cst_102 = arith.constant 1.000000e+00 : f32
    %170 = vector.broadcast %cst_102 : f32 to vector<8x256xf32>
    %171 = arith.cmpf ogt, %169, %170 : vector<8x256xf32>
    %172 = arith.extui %171 : vector<8x256xi1> to vector<8x256xi32>
    %173 = arith.sitofp %172 : vector<8x256xi32> to vector<8x256xf32>
    %c32_103 = arith.constant 32 : index
    %c0_104 = arith.constant 0 : index
    %174 = vector.load %arg12[%c32_103, %c0_104] : memref<64x256xf32, #tpu.memory_space<vmem>>, vector<8x256xf32>
    tpu.vector_store %arg12[%c32_103, %c0_104], %173 {strides = array<i32>} : memref<64x256xf32, #tpu.memory_space<vmem>>, vector<8x256xf32>,
    %c40_105 = arith.constant 40 : index
    %c0_106 = arith.constant 0 : index
    %175 = vector.load %arg10[%c40_105, %c0_106] : memref<64x256xf32, #tpu.memory_space<vmem>>, vector<8x256xf32>
    %cst_107 = arith.constant 0.899999976 : f32
    %176 = vector.broadcast %cst_107 : f32 to vector<8x256xf32>
    %177 = arith.mulf %176, %169 : vector<8x256xf32>
    %178 = arith.addf %177, %175 : vector<8x256xf32>
    %cst_108 = arith.constant 1.000000e+00 : f32
    %179 = vector.broadcast %cst_108 : f32 to vector<8x256xf32>
    %180 = arith.mulf %173, %179 : vector<8x256xf32>
    %181 = arith.subf %178, %180 : vector<8x256xf32>
    %cst_109 = arith.constant 1.000000e+00 : f32
    %182 = vector.broadcast %cst_109 : f32 to vector<8x256xf32>
    %183 = arith.cmpf ogt, %181, %182 : vector<8x256xf32>
    %184 = arith.extui %183 : vector<8x256xi1> to vector<8x256xi32>
    %185 = arith.sitofp %184 : vector<8x256xi32> to vector<8x256xf32>
    %c40_110 = arith.constant 40 : index
    %c0_111 = arith.constant 0 : index
    %186 = vector.load %arg12[%c40_110, %c0_111] : memref<64x256xf32, #tpu.memory_space<vmem>>, vector<8x256xf32>
    tpu.vector_store %arg12[%c40_110, %c0_111], %185 {strides = array<i32>} : memref<64x256xf32, #tpu.memory_space<vmem>>, vector<8x256xf32>,
    %c48_112 = arith.constant 48 : index
    %c0_113 = arith.constant 0 : index
    %187 = vector.load %arg10[%c48_112, %c0_113] : memref<64x256xf32, #tpu.memory_space<vmem>>, vector<8x256xf32>
    %cst_114 = arith.constant 0.899999976 : f32
    %188 = vector.broadcast %cst_114 : f32 to vector<8x256xf32>
    %189 = arith.mulf %188, %181 : vector<8x256xf32>
    %190 = arith.addf %189, %187 : vector<8x256xf32>
    %cst_115 = arith.constant 1.000000e+00 : f32
    %191 = vector.broadcast %cst_115 : f32 to vector<8x256xf32>
    %192 = arith.mulf %185, %191 : vector<8x256xf32>
    %193 = arith.subf %190, %192 : vector<8x256xf32>
    %cst_116 = arith.constant 1.000000e+00 : f32
    %194 = vector.broadcast %cst_116 : f32 to vector<8x256xf32>
    %195 = arith.cmpf ogt, %193, %194 : vector<8x256xf32>
    %196 = arith.extui %195 : vector<8x256xi1> to vector<8x256xi32>
    %197 = arith.sitofp %196 : vector<8x256xi32> to vector<8x256xf32>
    %c48_117 = arith.constant 48 : index
    %c0_118 = arith.constant 0 : index
    %198 = vector.load %arg12[%c48_117, %c0_118] : memref<64x256xf32, #tpu.memory_space<vmem>>, vector<8x256xf32>
    tpu.vector_store %arg12[%c48_117, %c0_118], %197 {strides = array<i32>} : memref<64x256xf32, #tpu.memory_space<vmem>>, vector<8x256xf32>,
    %c56_119 = arith.constant 56 : index
    %c0_120 = arith.constant 0 : index
    %199 = vector.load %arg10[%c56_119, %c0_120] : memref<64x256xf32, #tpu.memory_space<vmem>>, vector<8x256xf32>
    %cst_121 = arith.constant 0.899999976 : f32
    %200 = vector.broadcast %cst_121 : f32 to vector<8x256xf32>
    %201 = arith.mulf %200, %193 : vector<8x256xf32>
    %202 = arith.addf %201, %199 : vector<8x256xf32>
    %cst_122 = arith.constant 1.000000e+00 : f32
    %203 = vector.broadcast %cst_122 : f32 to vector<8x256xf32>
    %204 = arith.mulf %197, %203 : vector<8x256xf32>
    %205 = arith.subf %202, %204 : vector<8x256xf32>
    %cst_123 = arith.constant 1.000000e+00 : f32
    %206 = vector.broadcast %cst_123 : f32 to vector<8x256xf32>
    %207 = arith.cmpf ogt, %205, %206 : vector<8x256xf32>
    %208 = arith.extui %207 : vector<8x256xi1> to vector<8x256xi32>
    %209 = arith.sitofp %208 : vector<8x256xi32> to vector<8x256xf32>
    %c56_124 = arith.constant 56 : index
    %c0_125 = arith.constant 0 : index
    %210 = vector.load %arg12[%c56_124, %c0_125] : memref<64x256xf32, #tpu.memory_space<vmem>>, vector<8x256xf32>
    tpu.vector_store %arg12[%c56_124, %c0_125], %209 {strides = array<i32>} : memref<64x256xf32, #tpu.memory_space<vmem>>, vector<8x256xf32>,
    %c0_126 = arith.constant 0 : index
    %c0_127 = arith.constant 0 : index
    %211 = vector.load %arg12[%c0_126, %c0_127] : memref<64x256xf32, #tpu.memory_space<vmem>>, vector<64x256xf32>
    %c0_128 = arith.constant 0 : index
    %c0_129 = arith.constant 0 : index
    %212 = vector.load %arg6[%c0_128, %c0_129] : memref<256x128xf32, #tpu.memory_space<vmem>>, vector<256x128xf32>
    %cst_130 = arith.constant dense<0.000000e+00> : vector<64x128xf32>
    %213 = tpu.matmul %211, %212, %cst_130 {dimension_numbers = #tpu.dot_dimension_numbers<[1], [0], [0], [1], [0, 0, 1, 1], [], []>} : vector<64x256xf32>, vector<256x128xf32>, vector<64x128xf32> -> vector<64x128xf32>
    %c0_131 = arith.constant 0 : index
    %c0_132 = arith.constant 0 : index
    %214 = vector.load %arg7[%c0_131, %c0_132] : memref<1x128xf32, #tpu.memory_space<vmem>>, vector<1x128xf32>
    %215 = vector.broadcast %214 : vector<1x128xf32> to vector<64x128xf32>
    %216 = arith.addf %213, %215 : vector<64x128xf32>
    %cst_133 = arith.constant 0.000000e+00 : f32
    %217 = vector.broadcast %cst_133 : f32 to vector<8x128xf32>
    %cst_134 = arith.constant 0.000000e+00 : f32
    %218 = vector.broadcast %cst_134 : f32 to vector<8x128xf32>
    %219 = vector.extract_strided_slice %216 {offsets = [0, 0], sizes = [8, 128], strides = [1, 1]} : vector<64x128xf32> to vector<8x128xf32>
    %cst_135 = arith.constant 0.899999976 : f32
    %220 = vector.broadcast %cst_135 : f32 to vector<8x128xf32>
    %221 = arith.mulf %220, %217 : vector<8x128xf32>
    %222 = arith.addf %221, %219 : vector<8x128xf32>
    %cst_136 = arith.constant 1.000000e+00 : f32
    %223 = vector.broadcast %cst_136 : f32 to vector<8x128xf32>
    %224 = arith.mulf %218, %223 : vector<8x128xf32>
    %225 = arith.subf %222, %224 : vector<8x128xf32>
    %cst_137 = arith.constant 1.000000e+00 : f32
    %226 = vector.broadcast %cst_137 : f32 to vector<8x128xf32>
    %227 = arith.cmpf ogt, %225, %226 : vector<8x128xf32>
    %228 = arith.extui %227 : vector<8x128xi1> to vector<8x128xi32>
    %229 = arith.sitofp %228 : vector<8x128xi32> to vector<8x128xf32>
    %c0_138 = arith.constant 0 : index
    %c0_139 = arith.constant 0 : index
    %c0_140 = arith.constant 0 : index
    %230 = vector.load %arg8[%c0_138, %c0_139, %c0_140] : memref<8x8x128xf32, #tpu.memory_space<vmem>>, vector<1x8x128xf32>
    %231 = vector.shape_cast %230 : vector<1x8x128xf32> to vector<8x128xf32>
    %232 = vector.shape_cast %229 : vector<8x128xf32> to vector<1x8x128xf32>
    tpu.vector_store %arg8[%c0_138, %c0_139, %c0_140], %232 {strides = array<i32>} : memref<8x8x128xf32, #tpu.memory_space<vmem>>, vector<1x8x128xf32>,
    %c0_141 = arith.constant 0 : index
    %c0_142 = arith.constant 0 : index
    %c0_143 = arith.constant 0 : index
    %233 = vector.load %arg9[%c0_141, %c0_142, %c0_143] : memref<8x8x128xf32, #tpu.memory_space<vmem>>, vector<1x8x128xf32>
    %234 = vector.shape_cast %233 : vector<1x8x128xf32> to vector<8x128xf32>
    %235 = vector.shape_cast %225 : vector<8x128xf32> to vector<1x8x128xf32>
    tpu.vector_store %arg9[%c0_141, %c0_142, %c0_143], %235 {strides = array<i32>} : memref<8x8x128xf32, #tpu.memory_space<vmem>>, vector<1x8x128xf32>,
    %236 = vector.extract_strided_slice %216 {offsets = [8, 0], sizes = [8, 128], strides = [1, 1]} : vector<64x128xf32> to vector<8x128xf32>
    %cst_144 = arith.constant 0.899999976 : f32
    %237 = vector.broadcast %cst_144 : f32 to vector<8x128xf32>
    %238 = arith.mulf %237, %225 : vector<8x128xf32>
    %239 = arith.addf %238, %236 : vector<8x128xf32>
    %cst_145 = arith.constant 1.000000e+00 : f32
    %240 = vector.broadcast %cst_145 : f32 to vector<8x128xf32>
    %241 = arith.mulf %229, %240 : vector<8x128xf32>
    %242 = arith.subf %239, %241 : vector<8x128xf32>
    %cst_146 = arith.constant 1.000000e+00 : f32
    %243 = vector.broadcast %cst_146 : f32 to vector<8x128xf32>
    %244 = arith.cmpf ogt, %242, %243 : vector<8x128xf32>
    %245 = arith.extui %244 : vector<8x128xi1> to vector<8x128xi32>
    %246 = arith.sitofp %245 : vector<8x128xi32> to vector<8x128xf32>
    %c1 = arith.constant 1 : index
    %c0_147 = arith.constant 0 : index
    %c0_148 = arith.constant 0 : index
    %247 = vector.load %arg8[%c1, %c0_147, %c0_148] : memref<8x8x128xf32, #tpu.memory_space<vmem>>, vector<1x8x128xf32>
    %248 = vector.shape_cast %247 : vector<1x8x128xf32> to vector<8x128xf32>
    %249 = vector.shape_cast %246 : vector<8x128xf32> to vector<1x8x128xf32>
    tpu.vector_store %arg8[%c1, %c0_147, %c0_148], %249 {strides = array<i32>} : memref<8x8x128xf32, #tpu.memory_space<vmem>>, vector<1x8x128xf32>,
    %c1_149 = arith.constant 1 : index
    %c0_150 = arith.constant 0 : index
    %c0_151 = arith.constant 0 : index
    %250 = vector.load %arg9[%c1_149, %c0_150, %c0_151] : memref<8x8x128xf32, #tpu.memory_space<vmem>>, vector<1x8x128xf32>
    %251 = vector.shape_cast %250 : vector<1x8x128xf32> to vector<8x128xf32>
    %252 = vector.shape_cast %242 : vector<8x128xf32> to vector<1x8x128xf32>
    tpu.vector_store %arg9[%c1_149, %c0_150, %c0_151], %252 {strides = array<i32>} : memref<8x8x128xf32, #tpu.memory_space<vmem>>, vector<1x8x128xf32>,
    %253 = vector.extract_strided_slice %216 {offsets = [16, 0], sizes = [8, 128], strides = [1, 1]} : vector<64x128xf32> to vector<8x128xf32>
    %cst_152 = arith.constant 0.899999976 : f32
    %254 = vector.broadcast %cst_152 : f32 to vector<8x128xf32>
    %255 = arith.mulf %254, %242 : vector<8x128xf32>
    %256 = arith.addf %255, %253 : vector<8x128xf32>
    %cst_153 = arith.constant 1.000000e+00 : f32
    %257 = vector.broadcast %cst_153 : f32 to vector<8x128xf32>
    %258 = arith.mulf %246, %257 : vector<8x128xf32>
    %259 = arith.subf %256, %258 : vector<8x128xf32>
    %cst_154 = arith.constant 1.000000e+00 : f32
    %260 = vector.broadcast %cst_154 : f32 to vector<8x128xf32>
    %261 = arith.cmpf ogt, %259, %260 : vector<8x128xf32>
    %262 = arith.extui %261 : vector<8x128xi1> to vector<8x128xi32>
    %263 = arith.sitofp %262 : vector<8x128xi32> to vector<8x128xf32>
    %c2 = arith.constant 2 : index
    %c0_155 = arith.constant 0 : index
    %c0_156 = arith.constant 0 : index
    %264 = vector.load %arg8[%c2, %c0_155, %c0_156] : memref<8x8x128xf32, #tpu.memory_space<vmem>>, vector<1x8x128xf32>
    %265 = vector.shape_cast %264 : vector<1x8x128xf32> to vector<8x128xf32>
    %266 = vector.shape_cast %263 : vector<8x128xf32> to vector<1x8x128xf32>
    tpu.vector_store %arg8[%c2, %c0_155, %c0_156], %266 {strides = array<i32>} : memref<8x8x128xf32, #tpu.memory_space<vmem>>, vector<1x8x128xf32>,
    %c2_157 = arith.constant 2 : index
    %c0_158 = arith.constant 0 : index
    %c0_159 = arith.constant 0 : index
    %267 = vector.load %arg9[%c2_157, %c0_158, %c0_159] : memref<8x8x128xf32, #tpu.memory_space<vmem>>, vector<1x8x128xf32>
    %268 = vector.shape_cast %267 : vector<1x8x128xf32> to vector<8x128xf32>
    %269 = vector.shape_cast %259 : vector<8x128xf32> to vector<1x8x128xf32>
    tpu.vector_store %arg9[%c2_157, %c0_158, %c0_159], %269 {strides = array<i32>} : memref<8x8x128xf32, #tpu.memory_space<vmem>>, vector<1x8x128xf32>,
    %270 = vector.extract_strided_slice %216 {offsets = [24, 0], sizes = [8, 128], strides = [1, 1]} : vector<64x128xf32> to vector<8x128xf32>
    %cst_160 = arith.constant 0.899999976 : f32
    %271 = vector.broadcast %cst_160 : f32 to vector<8x128xf32>
    %272 = arith.mulf %271, %259 : vector<8x128xf32>
    %273 = arith.addf %272, %270 : vector<8x128xf32>
    %cst_161 = arith.constant 1.000000e+00 : f32
    %274 = vector.broadcast %cst_161 : f32 to vector<8x128xf32>
    %275 = arith.mulf %263, %274 : vector<8x128xf32>
    %276 = arith.subf %273, %275 : vector<8x128xf32>
    %cst_162 = arith.constant 1.000000e+00 : f32
    %277 = vector.broadcast %cst_162 : f32 to vector<8x128xf32>
    %278 = arith.cmpf ogt, %276, %277 : vector<8x128xf32>
    %279 = arith.extui %278 : vector<8x128xi1> to vector<8x128xi32>
    %280 = arith.sitofp %279 : vector<8x128xi32> to vector<8x128xf32>
    %c3 = arith.constant 3 : index
    %c0_163 = arith.constant 0 : index
    %c0_164 = arith.constant 0 : index
    %281 = vector.load %arg8[%c3, %c0_163, %c0_164] : memref<8x8x128xf32, #tpu.memory_space<vmem>>, vector<1x8x128xf32>
    %282 = vector.shape_cast %281 : vector<1x8x128xf32> to vector<8x128xf32>
    %283 = vector.shape_cast %280 : vector<8x128xf32> to vector<1x8x128xf32>
    tpu.vector_store %arg8[%c3, %c0_163, %c0_164], %283 {strides = array<i32>} : memref<8x8x128xf32, #tpu.memory_space<vmem>>, vector<1x8x128xf32>,
    %c3_165 = arith.constant 3 : index
    %c0_166 = arith.constant 0 : index
    %c0_167 = arith.constant 0 : index
    %284 = vector.load %arg9[%c3_165, %c0_166, %c0_167] : memref<8x8x128xf32, #tpu.memory_space<vmem>>, vector<1x8x128xf32>
    %285 = vector.shape_cast %284 : vector<1x8x128xf32> to vector<8x128xf32>
    %286 = vector.shape_cast %276 : vector<8x128xf32> to vector<1x8x128xf32>
    tpu.vector_store %arg9[%c3_165, %c0_166, %c0_167], %286 {strides = array<i32>} : memref<8x8x128xf32, #tpu.memory_space<vmem>>, vector<1x8x128xf32>,
    %287 = vector.extract_strided_slice %216 {offsets = [32, 0], sizes = [8, 128], strides = [1, 1]} : vector<64x128xf32> to vector<8x128xf32>
    %cst_168 = arith.constant 0.899999976 : f32
    %288 = vector.broadcast %cst_168 : f32 to vector<8x128xf32>
    %289 = arith.mulf %288, %276 : vector<8x128xf32>
    %290 = arith.addf %289, %287 : vector<8x128xf32>
    %cst_169 = arith.constant 1.000000e+00 : f32
    %291 = vector.broadcast %cst_169 : f32 to vector<8x128xf32>
    %292 = arith.mulf %280, %291 : vector<8x128xf32>
    %293 = arith.subf %290, %292 : vector<8x128xf32>
    %cst_170 = arith.constant 1.000000e+00 : f32
    %294 = vector.broadcast %cst_170 : f32 to vector<8x128xf32>
    %295 = arith.cmpf ogt, %293, %294 : vector<8x128xf32>
    %296 = arith.extui %295 : vector<8x128xi1> to vector<8x128xi32>
    %297 = arith.sitofp %296 : vector<8x128xi32> to vector<8x128xf32>
    %c4 = arith.constant 4 : index
    %c0_171 = arith.constant 0 : index
    %c0_172 = arith.constant 0 : index
    %298 = vector.load %arg8[%c4, %c0_171, %c0_172] : memref<8x8x128xf32, #tpu.memory_space<vmem>>, vector<1x8x128xf32>
    %299 = vector.shape_cast %298 : vector<1x8x128xf32> to vector<8x128xf32>
    %300 = vector.shape_cast %297 : vector<8x128xf32> to vector<1x8x128xf32>
    tpu.vector_store %arg8[%c4, %c0_171, %c0_172], %300 {strides = array<i32>} : memref<8x8x128xf32, #tpu.memory_space<vmem>>, vector<1x8x128xf32>,
    %c4_173 = arith.constant 4 : index
    %c0_174 = arith.constant 0 : index
    %c0_175 = arith.constant 0 : index
    %301 = vector.load %arg9[%c4_173, %c0_174, %c0_175] : memref<8x8x128xf32, #tpu.memory_space<vmem>>, vector<1x8x128xf32>
    %302 = vector.shape_cast %301 : vector<1x8x128xf32> to vector<8x128xf32>
    %303 = vector.shape_cast %293 : vector<8x128xf32> to vector<1x8x128xf32>
    tpu.vector_store %arg9[%c4_173, %c0_174, %c0_175], %303 {strides = array<i32>} : memref<8x8x128xf32, #tpu.memory_space<vmem>>, vector<1x8x128xf32>,
    %304 = vector.extract_strided_slice %216 {offsets = [40, 0], sizes = [8, 128], strides = [1, 1]} : vector<64x128xf32> to vector<8x128xf32>
    %cst_176 = arith.constant 0.899999976 : f32
    %305 = vector.broadcast %cst_176 : f32 to vector<8x128xf32>
    %306 = arith.mulf %305, %293 : vector<8x128xf32>
    %307 = arith.addf %306, %304 : vector<8x128xf32>
    %cst_177 = arith.constant 1.000000e+00 : f32
    %308 = vector.broadcast %cst_177 : f32 to vector<8x128xf32>
    %309 = arith.mulf %297, %308 : vector<8x128xf32>
    %310 = arith.subf %307, %309 : vector<8x128xf32>
    %cst_178 = arith.constant 1.000000e+00 : f32
    %311 = vector.broadcast %cst_178 : f32 to vector<8x128xf32>
    %312 = arith.cmpf ogt, %310, %311 : vector<8x128xf32>
    %313 = arith.extui %312 : vector<8x128xi1> to vector<8x128xi32>
    %314 = arith.sitofp %313 : vector<8x128xi32> to vector<8x128xf32>
    %c5 = arith.constant 5 : index
    %c0_179 = arith.constant 0 : index
    %c0_180 = arith.constant 0 : index
    %315 = vector.load %arg8[%c5, %c0_179, %c0_180] : memref<8x8x128xf32, #tpu.memory_space<vmem>>, vector<1x8x128xf32>
    %316 = vector.shape_cast %315 : vector<1x8x128xf32> to vector<8x128xf32>
    %317 = vector.shape_cast %314 : vector<8x128xf32> to vector<1x8x128xf32>
    tpu.vector_store %arg8[%c5, %c0_179, %c0_180], %317 {strides = array<i32>} : memref<8x8x128xf32, #tpu.memory_space<vmem>>, vector<1x8x128xf32>,
    %c5_181 = arith.constant 5 : index
    %c0_182 = arith.constant 0 : index
    %c0_183 = arith.constant 0 : index
    %318 = vector.load %arg9[%c5_181, %c0_182, %c0_183] : memref<8x8x128xf32, #tpu.memory_space<vmem>>, vector<1x8x128xf32>
    %319 = vector.shape_cast %318 : vector<1x8x128xf32> to vector<8x128xf32>
    %320 = vector.shape_cast %310 : vector<8x128xf32> to vector<1x8x128xf32>
    tpu.vector_store %arg9[%c5_181, %c0_182, %c0_183], %320 {strides = array<i32>} : memref<8x8x128xf32, #tpu.memory_space<vmem>>, vector<1x8x128xf32>,
    %321 = vector.extract_strided_slice %216 {offsets = [48, 0], sizes = [8, 128], strides = [1, 1]} : vector<64x128xf32> to vector<8x128xf32>
    %cst_184 = arith.constant 0.899999976 : f32
    %322 = vector.broadcast %cst_184 : f32 to vector<8x128xf32>
    %323 = arith.mulf %322, %310 : vector<8x128xf32>
    %324 = arith.addf %323, %321 : vector<8x128xf32>
    %cst_185 = arith.constant 1.000000e+00 : f32
    %325 = vector.broadcast %cst_185 : f32 to vector<8x128xf32>
    %326 = arith.mulf %314, %325 : vector<8x128xf32>
    %327 = arith.subf %324, %326 : vector<8x128xf32>
    %cst_186 = arith.constant 1.000000e+00 : f32
    %328 = vector.broadcast %cst_186 : f32 to vector<8x128xf32>
    %329 = arith.cmpf ogt, %327, %328 : vector<8x128xf32>
    %330 = arith.extui %329 : vector<8x128xi1> to vector<8x128xi32>
    %331 = arith.sitofp %330 : vector<8x128xi32> to vector<8x128xf32>
    %c6 = arith.constant 6 : index
    %c0_187 = arith.constant 0 : index
    %c0_188 = arith.constant 0 : index
    %332 = vector.load %arg8[%c6, %c0_187, %c0_188] : memref<8x8x128xf32, #tpu.memory_space<vmem>>, vector<1x8x128xf32>
    %333 = vector.shape_cast %332 : vector<1x8x128xf32> to vector<8x128xf32>
    %334 = vector.shape_cast %331 : vector<8x128xf32> to vector<1x8x128xf32>
    tpu.vector_store %arg8[%c6, %c0_187, %c0_188], %334 {strides = array<i32>} : memref<8x8x128xf32, #tpu.memory_space<vmem>>, vector<1x8x128xf32>,
    %c6_189 = arith.constant 6 : index
    %c0_190 = arith.constant 0 : index
    %c0_191 = arith.constant 0 : index
    %335 = vector.load %arg9[%c6_189, %c0_190, %c0_191] : memref<8x8x128xf32, #tpu.memory_space<vmem>>, vector<1x8x128xf32>
    %336 = vector.shape_cast %335 : vector<1x8x128xf32> to vector<8x128xf32>
    %337 = vector.shape_cast %327 : vector<8x128xf32> to vector<1x8x128xf32>
    tpu.vector_store %arg9[%c6_189, %c0_190, %c0_191], %337 {strides = array<i32>} : memref<8x8x128xf32, #tpu.memory_space<vmem>>, vector<1x8x128xf32>,
    %338 = vector.extract_strided_slice %216 {offsets = [56, 0], sizes = [8, 128], strides = [1, 1]} : vector<64x128xf32> to vector<8x128xf32>
    %cst_192 = arith.constant 0.899999976 : f32
    %339 = vector.broadcast %cst_192 : f32 to vector<8x128xf32>
    %340 = arith.mulf %339, %327 : vector<8x128xf32>
    %341 = arith.addf %340, %338 : vector<8x128xf32>
    %cst_193 = arith.constant 1.000000e+00 : f32
    %342 = vector.broadcast %cst_193 : f32 to vector<8x128xf32>
    %343 = arith.mulf %331, %342 : vector<8x128xf32>
    %344 = arith.subf %341, %343 : vector<8x128xf32>
    %cst_194 = arith.constant 1.000000e+00 : f32
    %345 = vector.broadcast %cst_194 : f32 to vector<8x128xf32>
    %346 = arith.cmpf ogt, %344, %345 : vector<8x128xf32>
    %347 = arith.extui %346 : vector<8x128xi1> to vector<8x128xi32>
    %348 = arith.sitofp %347 : vector<8x128xi32> to vector<8x128xf32>
    %c7 = arith.constant 7 : index
    %c0_195 = arith.constant 0 : index
    %c0_196 = arith.constant 0 : index
    %349 = vector.load %arg8[%c7, %c0_195, %c0_196] : memref<8x8x128xf32, #tpu.memory_space<vmem>>, vector<1x8x128xf32>
    %350 = vector.shape_cast %349 : vector<1x8x128xf32> to vector<8x128xf32>
    %351 = vector.shape_cast %348 : vector<8x128xf32> to vector<1x8x128xf32>
    tpu.vector_store %arg8[%c7, %c0_195, %c0_196], %351 {strides = array<i32>} : memref<8x8x128xf32, #tpu.memory_space<vmem>>, vector<1x8x128xf32>,
    %c7_197 = arith.constant 7 : index
    %c0_198 = arith.constant 0 : index
    %c0_199 = arith.constant 0 : index
    %352 = vector.load %arg9[%c7_197, %c0_198, %c0_199] : memref<8x8x128xf32, #tpu.memory_space<vmem>>, vector<1x8x128xf32>
    %353 = vector.shape_cast %352 : vector<1x8x128xf32> to vector<8x128xf32>
    %354 = vector.shape_cast %344 : vector<8x128xf32> to vector<1x8x128xf32>
    tpu.vector_store %arg9[%c7_197, %c0_198, %c0_199], %354 {strides = array<i32>} : memref<8x8x128xf32, #tpu.memory_space<vmem>>, vector<1x8x128xf32>,
    return
  }
  func.func @transform_0(%arg0: i32) -> (i32, i32, i32) {
    %c0_i32 = arith.constant 0 : i32
    %c0_i32_0 = arith.constant 0 : i32
    %c0_i32_1 = arith.constant 0 : i32
    %c0_i32_2 = arith.constant 0 : i32
    return %c0_i32, %c0_i32_0, %c0_i32_1 : i32, i32, i32
  }
  func.func @transform_1(%arg0: i32) -> (i32, i32) {
    %c0_i32 = arith.constant 0 : i32
    %c0_i32_0 = arith.constant 0 : i32
    %c0_i32_1 = arith.constant 0 : i32
    return %c0_i32, %c0_i32_0 : i32, i32
  }
  func.func @transform_2(%arg0: i32) -> (i32, i32) {
    %c0_i32 = arith.constant 0 : i32
    %c0_i32_0 = arith.constant 0 : i32
    %c0_i32_1 = arith.constant 0 : i32
    return %c0_i32, %c0_i32_0 : i32, i32
  }
  func.func @transform_3(%arg0: i32) -> (i32, i32) {
    %c0_i32 = arith.constant 0 : i32
    %c0_i32_0 = arith.constant 0 : i32
    %c0_i32_1 = arith.constant 0 : i32
    return %c0_i32, %c0_i32_0 : i32, i32
  }
  func.func @transform_4(%arg0: i32) -> (i32, i32) {
    %c0_i32 = arith.constant 0 : i32
    %c0_i32_0 = arith.constant 0 : i32
    %c0_i32_1 = arith.constant 0 : i32
    return %c0_i32, %c0_i32_0 : i32, i32
  }
  func.func @transform_5(%arg0: i32) -> (i32, i32) {
    %c0_i32 = arith.constant 0 : i32
    %c0_i32_0 = arith.constant 0 : i32
    %c0_i32_1 = arith.constant 0 : i32
    return %c0_i32, %c0_i32_0 : i32, i32
  }
  func.func @transform_6(%arg0: i32) -> (i32, i32) {
    %c0_i32 = arith.constant 0 : i32
    %c0_i32_0 = arith.constant 0 : i32
    %c0_i32_1 = arith.constant 0 : i32
    return %c0_i32, %c0_i32_0 : i32, i32
  }
  func.func @transform_7(%arg0: i32) -> (i32, i32, i32) {
    %c0_i32 = arith.constant 0 : i32
    %c0_i32_0 = arith.constant 0 : i32
    %c0_i32_1 = arith.constant 0 : i32
    %c0_i32_2 = arith.constant 0 : i32
    return %c0_i32, %c0_i32_0, %c0_i32_1 : i32, i32, i32
  }
  func.func @transform_8(%arg0: i32) -> (i32, i32, i32) {
    %c0_i32 = arith.constant 0 : i32
    %c0_i32_0 = arith.constant 0 : i32
    %c0_i32_1 = arith.constant 0 : i32
    %c0_i32_2 = arith.constant 0 : i32
    return %c0_i32, %c0_i32_0, %c0_i32_1 : i32, i32, i32
  }
}

</mosaic_0001>

<bundles_post_ra>
// kernel: tpu_custom_call.1
= control target key start
LH: loop header
LB: loop body
LE: loop exit
PB: predicated region body
PF: predicated region fallthrough
CT: control target
= control target key end

     0   :  { %14 = vsyncpa [#allocation6], 0  ;;  %s1738_s0 = inlined_call_operand.hbm [shape: f32[8,8,256], index: 0, kind: input, shape index: {}]   ;;  %s1739_s1 = inlined_call_operand.hbm [shape: f32[256,256], index: 1, kind: input, shape index: {}]   ;;  %s1740_s2 = inlined_call_operand.hbm [shape: f32[1,256], index: 2, kind: input, shape index: {}]   ;;  %s1741_s3 = inlined_call_operand.hbm [shape: f32[256,256], index: 3, kind: input, shape index: {}]   ;;  %s1742_s4 = inlined_call_operand.vmem [shape: f32[1,256], index: 4, kind: input, shape index: {}]   ;;  %s1743_s5 = inlined_call_operand.hbm [shape: f32[256,128], index: 5, kind: input, shape index: {}]   ;;  %s1744_s6 = inlined_call_operand.vmem [shape: f32[1,128], index: 6, kind: input, shape index: {}]   ;;  %s1745_s7 = inlined_call_operand.hbm [shape: f32[8,8,128], index: 7, kind: output, shape index: {0}]   ;;  %s1746_s8 = inlined_call_operand.hbm [shape: f32[8,8,128], index: 8, kind: output, shape index: {1}]  }
   0x1   :  { %15 = vsyncpa [#allocation9], 0 }
   0x2   :  { %16 = vsyncpa [#allocation12], 0 }
   0x3   :  { %17 = vsyncpa [#allocation7], 0 }
   0x4   :  { %18 = vsyncpa [#allocation16], 0  ;;  %s36_s29 = sshll.u32 %s1739_s1, 4  ;;  %s1447_s30 = smov [#allocation8]   ;;  %s37_s29 = int_to_ptr.hbm [resolvable:$true] %s36_s29 }
   0x5   :  { %s38_s9 = sshll.u32 %s1447_s30, 4  ;;  %s60_s12 = sshll.u32 %s1741_s3, 4  ;;  %s39_s9 = int_to_ptr.vmem [resolvable:$true] %s38_s9  ;;  %s61_s12 = int_to_ptr.hbm [resolvable:$true] %s60_s12 }
   0x6   :  { %s1448_s13 = smov 256   ;;  %s1449_s14 = smov 16  }
   0x7   :  { %44 = dma.hbm_to_vmem [thread:$0]  %s37_s29, 8192, %s39_s9, [#allocation9], %s1448_s13, %s1448_s13, %s1449_s14  }
   0x8   :  { %s1450_s15 = smov [#allocation11]   ;;  %s23_s19 = sshll.u32 %s1738_s0, 4  ;;  %s24_s19 = int_to_ptr.hbm [resolvable:$true] %s23_s19 }
   0x9   :  { %s62_s16 = sshll.u32 %s1450_s15, 4  ;;  %s50_s21 = sshll.u32 %s1740_s2, 4  ;;  %s63_s16 = int_to_ptr.vmem [resolvable:$true] %s62_s16  ;;  %s51_s21 = int_to_ptr.hbm [resolvable:$true] %s50_s21 }
   0xa   :  { %68 = dma.hbm_to_vmem [thread:$0]  %s61_s12, 8192, %s63_s16, [#allocation12], %s1448_s13, %s1448_s13, %s1449_s14  }
   0xb   :  { %s1451_s22 = smov [#allocation5]   ;;  %s1452_s3 = smov [#allocation10]  }
   0xc   :  { %s25_s23 = sshll.u32 %s1451_s22, 4  ;;  %s52_s24 = sshll.u32 %s1452_s3, 4  ;;  %s26_s23 = int_to_ptr.vmem [resolvable:$true] %s25_s23  ;;  %s53_s24 = int_to_ptr.vmem [resolvable:$true] %s52_s24 }
   0xd   :  { %31 = dma.hbm_to_vmem [thread:$0]  %s24_s19, 2048, %s26_s23, [#allocation6], %s1448_s13, %s1448_s13, %s1449_s14  }
   0xe   :  { %s75_s27 = sshll.u32 %s1743_s5, 4  ;;  %s1453_s0 = smov [#allocation13]   ;;  %s76_s27 = int_to_ptr.hbm [resolvable:$true] %s75_s27 }
   0xf   :  { %55 = dma.hbm_to_vmem [thread:$0]  %s51_s21, 32, %s53_s24, [#allocation9]  }
  0x10   :  { %s77_s28 = sshll.u32 %s1453_s0, 4  ;;  %s1454_s29 = smov 128   ;;  %s78_s28 = int_to_ptr.vmem [resolvable:$true] %s77_s28 }
  0x11   :  { %s1455_s30 = smov 8  }
  0x12   :  { %83 = dma.hbm_to_vmem [thread:$0]  %s76_s27, 4096, %s78_s28, [#allocation12], %s1454_s29, %s1454_s29, %s1455_s30  }
  0x13   :  { %1437 = dma.done.wait [#allocation6], 2048  }
  0x14   :  { %1438 = vsyncadd [#allocation6], 4294965248 }
  0x15   :  { %1439 = dma.done.wait [#allocation9], 8224  }
  0x16   :  { %1440 = vsyncadd [#allocation9], 4294959072 }
  0x17   :  { %1441 = dma.done.wait [#allocation12], 12288  }
  0x18   :  { %1442 = vsyncadd [#allocation12], 4294955008  ;;  %v152_v0 = vld [vmem:[#allocation8 + $0xf0] sm:$0xff]  ;;  %v150_v1 = vld [vmem:[#allocation8 + $0xe0] sm:$0xff]  ;;  %s1115_s13 = sshll.u32 %s1746_s8, 4  ;;  %s1459_s14 = smov [#allocation14]   ;;  %s1116_s13 = int_to_ptr.hbm [resolvable:$true] %s1115_s13 }
  0x19   :  { %v184_v2 = vld [vmem:[#allocation8 + $0x1f0] sm:$0xff]  ;;  %192 = vmatpush.msra.mxu0 %v152_v0  ;;  %1223 = vmatpush.msra.mxu2 %v152_v0  ;;  %v182_v3 = vld [vmem:[#allocation8 + $0x1e0] sm:$0xff]  ;;  %v153_v33 = vld [vmem:[#allocation8 + $0xf8] sm:$0xff]  ;;  %s1100_s15 = sshll.u32 %s1459_s14, 4  ;;  %s1102_s18 = sshll.u32 %s1745_s7, 4  ;;  %s1101_s15 = int_to_ptr.vmem [resolvable:$true] %s1100_s15  ;;  %s1103_s18 = int_to_ptr.hbm [resolvable:$true] %s1102_s18 }
  0x1a   :  { %233 = vmatpush.msra.mxu1 %v184_v2  ;;  %1239 = vmatpush.msra.mxu3 %v184_v2  ;;  %v148_v4 = vld [vmem:[#allocation8 + $0xd0] sm:$0xff]  ;;  %v146_v6 = vld [vmem:[#allocation8 + $0xc0] sm:$0xff]  ;;  %v1527_v35 = vld [vmem:[#allocation5 + $0x8] sm:$0xff] }
  0x1b   :  { %193 = vmatpush.msra.mxu0 %v150_v1  ;;  %1224 = vmatpush.msra.mxu2 %v150_v1  ;;  %v180_v5 = vld [vmem:[#allocation8 + $0x1d0] sm:$0xff]  ;;  %v178_v7 = vld [vmem:[#allocation8 + $0x1c0] sm:$0xff]  ;;  %v1531_v36 = vld [vmem:[#allocation5 + $0x48] sm:$0xff] }
  0x1c   :  { %234 = vmatpush.msra.mxu1 %v182_v3  ;;  %1240 = vmatpush.msra.mxu3 %v182_v3  ;;  %v144_v8 = vld [vmem:[#allocation8 + $0xb0] sm:$0xff]  ;;  %v142_v10 = vld [vmem:[#allocation8 + $0xa0] sm:$0xff]  ;;  %v151_v37 = vld [vmem:[#allocation8 + $0xe8] sm:$0xff] }
  0x1d   :  { %194 = vmatpush.msra.mxu0 %v148_v4  ;;  %1225 = vmatpush.msra.mxu2 %v148_v4  ;;  %v176_v9 = vld [vmem:[#allocation8 + $0x1b0] sm:$0xff]  ;;  %v174_v11 = vld [vmem:[#allocation8 + $0x1a0] sm:$0xff]  ;;  %v185_v38 = vld [vmem:[#allocation8 + $0x1f8] sm:$0xff] }
  0x1e   :  { %235 = vmatpush.msra.mxu1 %v180_v5  ;;  %1241 = vmatpush.msra.mxu3 %v180_v5  ;;  %v140_v12 = vld [vmem:[#allocation8 + $0x90] sm:$0xff]  ;;  %v138_v14 = vld [vmem:[#allocation8 + $0x80] sm:$0xff]  ;;  %v149_v39 = vld [vmem:[#allocation8 + $0xd8] sm:$0xff] }
  0x1f   :  { %195 = vmatpush.msra.mxu0 %v146_v6  ;;  %1226 = vmatpush.msra.mxu2 %v146_v6  ;;  %v172_v13 = vld [vmem:[#allocation8 + $0x190] sm:$0xff]  ;;  %v170_v15 = vld [vmem:[#allocation8 + $0x180] sm:$0xff]  ;;  %v183_v40 = vld [vmem:[#allocation8 + $0x1e8] sm:$0xff] }
  0x20   :  { %236 = vmatpush.msra.mxu1 %v178_v7  ;;  %1242 = vmatpush.msra.mxu3 %v178_v7  ;;  %v136_v16 = vld [vmem:[#allocation8 + $0x70] sm:$0xff]  ;;  %v134_v18 = vld [vmem:[#allocation8 + $0x60] sm:$0xff]  ;;  %v147_v41 = vld [vmem:[#allocation8 + $0xc8] sm:$0xff] }
  0x21   :  { %196 = vmatpush.msra.mxu0 %v144_v8  ;;  %1227 = vmatpush.msra.mxu2 %v144_v8  ;;  %v168_v17 = vld [vmem:[#allocation8 + $0x170] sm:$0xff]  ;;  %v166_v19 = vld [vmem:[#allocation8 + $0x160] sm:$0xff]  ;;  %v181_v42 = vld [vmem:[#allocation8 + $0x1d8] sm:$0xff] }
  0x22   :  { %237 = vmatpush.msra.mxu1 %v176_v9  ;;  %1243 = vmatpush.msra.mxu3 %v176_v9  ;;  %v132_v20 = vld [vmem:[#allocation8 + $0x50] sm:$0xff]  ;;  %v130_v22 = vld [vmem:[#allocation8 + $0x40] sm:$0xff]  ;;  %v145_v45 = vld [vmem:[#allocation8 + $0xb8] sm:$0xff] }
  0x23   :  { %197 = vmatpush.msra.mxu0 %v142_v10  ;;  %1228 = vmatpush.msra.mxu2 %v142_v10  ;;  %v164_v21 = vld [vmem:[#allocation8 + $0x150] sm:$0xff]  ;;  %v162_v23 = vld [vmem:[#allocation8 + $0x140] sm:$0xff]  ;;  %v179_v46 = vld [vmem:[#allocation8 + $0x1c8] sm:$0xff] }
  0x24   :  { %238 = vmatpush.msra.mxu1 %v174_v11  ;;  %1244 = vmatpush.msra.mxu3 %v174_v11  ;;  %v128_v24 = vld [vmem:[#allocation8 + $0x30] sm:$0xff]  ;;  %v126_v26 = vld [vmem:[#allocation8 + $0x20] sm:$0xff]  ;;  %v1540_v47 = vld [vmem:[#allocation5 + $0x18] sm:$0xff] }
  0x25   :  { %198 = vmatpush.msra.mxu0 %v140_v12  ;;  %1229 = vmatpush.msra.mxu2 %v140_v12  ;;  %v160_v25 = vld [vmem:[#allocation8 + $0x130] sm:$0xff]  ;;  %v158_v27 = vld [vmem:[#allocation8 + $0x120] sm:$0xff]  ;;  %v1542_v48 = vld [vmem:[#allocation5 + $0x58] sm:$0xff] }
  0x26   :  { %239 = vmatpush.msra.mxu1 %v172_v13  ;;  %1245 = vmatpush.msra.mxu3 %v172_v13  ;;  %v124_v28 = vld [vmem:[#allocation8 + $0x10] sm:$0xff]  ;;  %v122_v30 = vld [vmem:[#allocation8] sm:$0xff]  ;;  %v143_v49 = vld [vmem:[#allocation8 + $0xa8] sm:$0xff] }
  0x27   :  { %199 = vmatpush.msra.mxu0 %v138_v14  ;;  %1230 = vmatpush.msra.mxu2 %v138_v14  ;;  %v156_v29 = vld [vmem:[#allocation8 + $0x110] sm:$0xff]  ;;  %v1523_v31 = vld [vmem:[#allocation5] sm:$0xff]  ;;  %v177_v50 = vld [vmem:[#allocation8 + $0x1b8] sm:$0xff] }
  0x28   :  { %240 = vmatpush.msra.mxu1 %v170_v15  ;;  %1246 = vmatpush.msra.mxu3 %v170_v15  ;;  %v1525_v32 = vld [vmem:[#allocation5 + $0x40] sm:$0xff]  ;;  %v1535_v43 = vld [vmem:[#allocation5 + $0x10] sm:$0xff]  ;;  %v141_v51 = vld [vmem:[#allocation8 + $0x98] sm:$0xff] }
  0x29   :  { %200 = vmatpush.msra.mxu0 %v136_v16  ;;  %1231 = vmatpush.msra.mxu2 %v136_v16  ;;  %v154_v34 = vld [vmem:[#allocation8 + $0x100] sm:$0xff]  ;;  %v1537_v44 = vld [vmem:[#allocation5 + $0x50] sm:$0xff]  ;;  %v175_v52 = vld [vmem:[#allocation8 + $0x1a8] sm:$0xff] }
  0x2a   :  { %241 = vmatpush.msra.mxu1 %v168_v17  ;;  %1247 = vmatpush.msra.mxu3 %v168_v17  ;;  %v139_v53 = vld [vmem:[#allocation8 + $0x88] sm:$0xff]  ;;  %v173_v54 = vld [vmem:[#allocation8 + $0x198] sm:$0xff]  ;;  %v110_v55 = vld [vmem:[#allocation5 + $0x20] sm:$0xff] }
  0x2b   :  { %201 = vmatpush.msra.mxu0 %v134_v18  ;;  %1232 = vmatpush.msra.mxu2 %v134_v18  ;;  %v1547_v56 = vld [vmem:[#allocation5 + $0x60] sm:$0xff]  ;;  %v137_v57 = vld [vmem:[#allocation8 + $0x78] sm:$0xff]  ;;  %v171_v58 = vld [vmem:[#allocation8 + $0x188] sm:$0xff] }
  0x2c   :  { %242 = vmatpush.msra.mxu1 %v166_v19  ;;  %1248 = vmatpush.msra.mxu3 %v166_v19  ;;  %v111_v59 = vld [vmem:[#allocation5 + $0x28] sm:$0xff]  ;;  %v169_v62 = vld [vmem:[#allocation8 + $0x178] sm:$0xff]  ;;  %v112_v3 = vld [vmem:[#allocation5 + $0x30] sm:$0xff] }
  0x2d   :  { %202 = vmatpush.msra.mxu0 %v132_v20  ;;  %1233 = vmatpush.msra.mxu2 %v132_v20  ;;  %v1549_v60 = vld [vmem:[#allocation5 + $0x68] sm:$0xff]  ;;  %v133_v63 = vld [vmem:[#allocation8 + $0x58] sm:$0xff]  ;;  %v1553_v4 = vld [vmem:[#allocation5 + $0x70] sm:$0xff] }
  0x2e   :  { %243 = vmatpush.msra.mxu1 %v164_v21  ;;  %1249 = vmatpush.msra.mxu3 %v164_v21  ;;  %v135_v61 = vld [vmem:[#allocation8 + $0x68] sm:$0xff]  ;;  %v165_v2 = vld [vmem:[#allocation8 + $0x158] sm:$0xff] }
  0x2f   :  { %203 = vmatpush.msra.mxu0 %v130_v22  ;;  %1234 = vmatpush.msra.mxu2 %v130_v22  ;;  %v167_v0 = vld [vmem:[#allocation8 + $0x168] sm:$0xff]  ;;  %v129_v5 = vld [vmem:[#allocation8 + $0x38] sm:$0xff] }
  0x30   :  { %244 = vmatpush.msra.mxu1 %v162_v23  ;;  %1250 = vmatpush.msra.mxu3 %v162_v23  ;;  %v131_v1 = vld [vmem:[#allocation8 + $0x48] sm:$0xff]  ;;  %v113_v7 = vld [vmem:[#allocation5 + $0x38] sm:$0xff] }
  0x31   :  { %204 = vmatpush.msra.mxu0 %v128_v24  ;;  %1235 = vmatpush.msra.mxu2 %v128_v24  ;;  %v163_v6 = vld [vmem:[#allocation8 + $0x148] sm:$0xff]  ;;  %v1555_v8 = vld [vmem:[#allocation5 + $0x78] sm:$0xff] }
  0x32   :  { %245 = vmatpush.msra.mxu1 %v160_v25  ;;  %1251 = vmatpush.msra.mxu3 %v160_v25  ;;  %v127_v9 = vld [vmem:[#allocation8 + $0x28] sm:$0xff]  ;;  %v161_v10 = vld [vmem:[#allocation8 + $0x138] sm:$0xff] }
  0x33   :  { %205 = vmatpush.msra.mxu0 %v126_v26  ;;  %1236 = vmatpush.msra.mxu2 %v126_v26  ;;  %v125_v11 = vld [vmem:[#allocation8 + $0x18] sm:$0xff]  ;;  %v159_v12 = vld [vmem:[#allocation8 + $0x128] sm:$0xff] }
  0x34   :  { %246 = vmatpush.msra.mxu1 %v158_v27  ;;  %1252 = vmatpush.msra.mxu3 %v158_v27  ;;  %v123_v13 = vld [vmem:[#allocation8 + $0x8] sm:$0xff]  ;;  %v157_v14 = vld [vmem:[#allocation8 + $0x118] sm:$0xff] }
  0x35   :  { %206 = vmatpush.msra.mxu0 %v124_v28  ;;  %1237 = vmatpush.msra.mxu2 %v124_v28  ;;  %v155_v15 = vld [vmem:[#allocation8 + $0x108] sm:$0xff]  ;;  %v542_v16 = vld [vmem:[#allocation11 + $0xf0] sm:$0xff]  ;;  %v543_v17 = vld [vmem:[#allocation11 + $0xf8] sm:$0xff] }
  0x36   :  { %247 = vmatpush.msra.mxu1 %v156_v29  ;;  %1253 = vmatpush.msra.mxu3 %v156_v29  ;;  %v540_v18 = vld [vmem:[#allocation11 + $0xe0] sm:$0xff]  ;;  %v541_v19 = vld [vmem:[#allocation11 + $0xe8] sm:$0xff]  ;;  %v538_v20 = vld [vmem:[#allocation11 + $0xd0] sm:$0xff] }
  0x37   :  { %207 = vmatpush.msra.mxu0 %v122_v30  ;;  %1238 = vmatpush.msra.mxu2 %v122_v30  ;;  %v539_v21 = vld [vmem:[#allocation11 + $0xd8] sm:$0xff]  ;;  %v573_v23 = vld [vmem:[#allocation11 + $0x1e8] sm:$0xff]  ;;  %v536_v24 = vld [vmem:[#allocation11 + $0xc0] sm:$0xff] }
  0x38   :  { %208 = vmatmul.f32.vlgmr.msra.gmra.mxu0 %v1523_v31  ;;  %220 = vmatmul.f32.vlgmr.msra.gmra.mxu2 %v1525_v32  ;;  %v575_v22 = vld [vmem:[#allocation11 + $0x1f8] sm:$0xff]  ;;  %v537_v25 = vld [vmem:[#allocation11 + $0xc8] sm:$0xff]  ;;  %v534_v26 = vld [vmem:[#allocation11 + $0xb0] sm:$0xff] }
  0x39   :  { %274 = vmatpush.msrb.mxu2 %v153_v33  ;;  %248 = vmatpush.msra.mxu1 %v154_v34  ;;  %v535_v27 = vld [vmem:[#allocation11 + $0xb8] sm:$0xff]  ;;  %v532_v29 = vld [vmem:[#allocation11 + $0xa0] sm:$0xff]  ;;  %v533_v30 = vld [vmem:[#allocation11 + $0xa8] sm:$0xff] }
  0x3a   :  { %1254 = vmatpush.msra.mxu3 %v154_v34  ;;  %249 = vmatmul.f32.vlgmr.msra.gmra.mxu1 %v1527_v35  ;;  %v571_v28 = vld [vmem:[#allocation11 + $0x1d8] sm:$0xff]  ;;  %v530_v33 = vld [vmem:[#allocation11 + $0x90] sm:$0xff] }
  0x3b   :  { %261 = vmatmul.f32.vlgmr.msra.gmra.mxu3 %v1531_v36  ;;  %275 = vmatpush.msrb.mxu2 %v151_v37  ;;  %v531_v34 = vld [vmem:[#allocation11 + $0x98] sm:$0xff]  ;;  %v526_v37 = vld [vmem:[#allocation11 + $0x70] sm:$0xff] }
  0x3c   :  { %315 = vmatpush.msrb.mxu3 %v185_v38  ;;  %582 = vmatpush.msrb.mxu0 %v542_v16  ;;  %v527_v38 = vld [vmem:[#allocation11 + $0x78] sm:$0xff]  ;;  %v550_v16 = vld [vmem:[#allocation11 + $0x130] sm:$0xff] }
  0x3d   :  { %276 = vmatpush.msrb.mxu2 %v149_v39  ;;  %v525_v39 = vld [vmem:[#allocation11 + $0x68] sm:$0xff] }
  0x3e   :  { %316 = vmatpush.msrb.mxu3 %v183_v40  ;;  %583 = vmatpush.msrb.mxu0 %v540_v18  ;;  %v522_v40 = vld [vmem:[#allocation11 + $0x50] sm:$0xff]  ;;  %v1456_v18 = vmov 1.0  }
  0x3f   :  { %277 = vmatpush.msrb.mxu2 %v147_v41  ;;  %v523_v41 = vld [vmem:[#allocation11 + $0x58] sm:$0xff] }
  0x40   :  { %317 = vmatpush.msrb.mxu3 %v181_v42  ;;  %211 = vmatmul.f32.gmra.mxu0 %v1535_v43  ;;  %v567_v42 = vld [vmem:[#allocation11 + $0x1b8] sm:$0xff] }
  0x41   :  { %223 = vmatmul.f32.gmra.mxu2 %v1537_v44  ;;  %584 = vmatpush.msrb.mxu0 %v538_v20 }
  0x42   :  { %278 = vmatpush.msrb.mxu2 %v145_v45  ;;  %318 = vmatpush.msrb.mxu3 %v179_v46  ;;  %v518_v45 = vld [vmem:[#allocation11 + $0x30] sm:$0xff]  ;;  %v519_v46 = vld [vmem:[#allocation11 + $0x38] sm:$0xff] }
  0x43   :  { %252 = vmatmul.f32.gmra.mxu1 %v1540_v47  ;;  %264 = vmatmul.f32.gmra.mxu3 %v1542_v48 }
  0x44   :  { %279 = vmatpush.msrb.mxu2 %v143_v49  ;;  %319 = vmatpush.msrb.mxu3 %v177_v50  ;;  %v565_v49 = vld [vmem:[#allocation11 + $0x1a8] sm:$0xff]  ;;  %v514_v50 = vld [vmem:[#allocation11 + $0x10] sm:$0xff] }
  0x45   :  { %585 = vmatpush.msrb.mxu0 %v536_v24  ;;  %v546_v24 = vld [vmem:[#allocation11 + $0x110] sm:$0xff] }
  0x46   :  { %280 = vmatpush.msrb.mxu2 %v141_v51  ;;  %320 = vmatpush.msrb.mxu3 %v175_v52  ;;  %v515_v51 = vld [vmem:[#allocation11 + $0x18] sm:$0xff]  ;;  %v512_v52 = vld [vmem:[#allocation11] sm:$0xff] }
  0x47   :  { %586 = vmatpush.msrb.mxu0 %v534_v26 }
  0x48   :  { %281 = vmatpush.msrb.mxu2 %v139_v53  ;;  %321 = vmatpush.msrb.mxu3 %v173_v54  ;;  %v513_v53 = vld [vmem:[#allocation11 + $0x8] sm:$0xff]  ;;  %v563_v54 = vld [vmem:[#allocation11 + $0x198] sm:$0xff] }
  0x49   :  { %214 = vmatmul.f32.gmra.mxu0 %v110_v55  ;;  %226 = vmatmul.f32.gmra.mxu2 %v1547_v56 }
  0x4a   :  { %282 = vmatpush.msrb.mxu2 %v137_v57  ;;  %322 = vmatpush.msrb.mxu3 %v171_v58  ;;  %v561_v57 = vld [vmem:[#allocation11 + $0x188] sm:$0xff]  ;;  %v570_v58 = vld [vmem:[#allocation11 + $0x1d0] sm:$0xff] }
  0x4b   :  { %255 = vmatmul.f32.gmra.mxu1 %v111_v59  ;;  %267 = vmatmul.f32.gmra.mxu3 %v1549_v60 }
  0x4c   :  { %283 = vmatpush.msrb.mxu2 %v135_v61  ;;  %323 = vmatpush.msrb.mxu3 %v169_v62  ;;  %v566_v61 = vld [vmem:[#allocation11 + $0x1b0] sm:$0xff]  ;;  %v564_v62 = vld [vmem:[#allocation11 + $0x1a0] sm:$0xff] }
  0x4d   :  { %587 = vmatpush.msrb.mxu0 %v532_v29 }
  0x4e   :  { %284 = vmatpush.msrb.mxu2 %v133_v63  ;;  %324 = vmatpush.msrb.mxu3 %v167_v0  ;;  %v557_v63 = vld [vmem:[#allocation11 + $0x168] sm:$0xff]  ;;  %v562_v0 = vld [vmem:[#allocation11 + $0x190] sm:$0xff] }
  0x4f   :  { %588 = vmatpush.msrb.mxu0 %v530_v33 }
  0x50   :  { %285 = vmatpush.msrb.mxu2 %v131_v1  ;;  %325 = vmatpush.msrb.mxu3 %v165_v2  ;;  %v1571_v1 = vld [vmem:[#allocation10] sm:$0x3] }
  0x51   :  { %217 = vmatmul.f32.gmra.mxu0 %v112_v3  ;;  %229 = vmatmul.f32.gmra.mxu2 %v1553_v4  ;;  %v555_v2 = vld [vmem:[#allocation11 + $0x158] sm:$0xff] }
  0x52   :  { %286 = vmatpush.msrb.mxu2 %v129_v5  ;;  %326 = vmatpush.msrb.mxu3 %v163_v6  ;;  %v558_v5 = vld [vmem:[#allocation11 + $0x170] sm:$0xff]  ;;  %v553_v6 = vld [vmem:[#allocation11 + $0x148] sm:$0xff] }
  0x53   :  { %258 = vmatmul.f32.gmra.mxu1 %v113_v7  ;;  %270 = vmatmul.f32.gmra.mxu3 %v1555_v8 }
  0x54   :  { %287 = vmatpush.msrb.mxu2 %v127_v9  ;;  %327 = vmatpush.msrb.mxu3 %v161_v10  ;;  %v554_v10 = vld [vmem:[#allocation11 + $0x150] sm:$0xff] }
  0x56   :  { %288 = vmatpush.msrb.mxu2 %v125_v11  ;;  %328 = vmatpush.msrb.mxu3 %v159_v12  ;;  %v551_v12 = vld [vmem:[#allocation11 + $0x138] sm:$0xff] }
  0x58   :  { %289 = vmatpush.msrb.mxu2 %v123_v13  ;;  %329 = vmatpush.msrb.mxu3 %v157_v14  ;;  %v552_v14 = vld [vmem:[#allocation11 + $0x140] sm:$0xff] }
  0x59   :  { %290 = vmatmul.f32.vlgmr.msrb.gmra.mxu2 %v1523_v31  ;;  %v569_v31 = vld [vmem:[#allocation11 + $0x1c8] sm:$0xff] }
  0x5a   :  { %330 = vmatpush.msrb.mxu3 %v155_v15  ;;  %664 = vmatpush.msra.mxu2 %v543_v17  ;;  %v549_v15 = vld [vmem:[#allocation11 + $0x128] sm:$0xff] }
  0x5b   :  { %331 = vmatmul.f32.vlgmr.msrb.gmra.mxu3 %v1527_v35  ;;  %v528_v35 = vld [vmem:[#allocation11 + $0x80] sm:$0xff] }
  0x5c   :  { %665 = vmatpush.msra.mxu2 %v541_v19  ;;  %705 = vmatpush.msra.mxu3 %v575_v22  ;;  %v548_v19 = vld [vmem:[#allocation11 + $0x120] sm:$0xff] }
  0x5d   :  { %589 = vmatpush.msrb.mxu0 %v528_v35 }
  0x5e   :  { %666 = vmatpush.msra.mxu2 %v539_v21  ;;  %706 = vmatpush.msra.mxu3 %v573_v23  ;;  %v547_v23 = vld [vmem:[#allocation11 + $0x118] sm:$0xff] }
  0x5f   :  { %590 = vmatpush.msrb.mxu0 %v526_v37 }
  0x60   :  { %667 = vmatpush.msra.mxu2 %v537_v25  ;;  %707 = vmatpush.msra.mxu3 %v571_v28  ;;  %v545_v28 = vld [vmem:[#allocation11 + $0x108] sm:$0xff] }
  0x61   :  { %293 = vmatmul.f32.gmra.mxu2 %v1535_v43  ;;  %v520_v43 = vld [vmem:[#allocation11 + $0x40] sm:$0xff] }
  0x62   :  { %668 = vmatpush.msra.mxu2 %v535_v27  ;;  %708 = vmatpush.msra.mxu3 %v569_v31  ;;  %v544_v27 = vld [vmem:[#allocation11 + $0x100] sm:$0xff] }
  0x63   :  { %334 = vmatmul.f32.gmra.mxu3 %v1540_v47  ;;  %v516_v47 = vld [vmem:[#allocation11 + $0x20] sm:$0xff] }
  0x64   :  { %669 = vmatpush.msra.mxu2 %v533_v30  ;;  %709 = vmatpush.msra.mxu3 %v567_v42  ;;  %v1457_v30 = vmov 0.0  }
  0x66   :  { %670 = vmatpush.msra.mxu2 %v531_v34  ;;  %710 = vmatpush.msra.mxu3 %v565_v49 }
  0x68   :  { %711 = vmatpush.msra.mxu3 %v563_v54 }
  0x69   :  { %296 = vmatmul.f32.gmra.mxu2 %v110_v55  ;;  %v574_v55 = vld [vmem:[#allocation11 + $0x1f0] sm:$0xff] }
  0x6a   :  { %623 = vmatpush.msrb.mxu1 %v574_v55  ;;  %712 = vmatpush.msra.mxu3 %v561_v57 }
  0x6b   :  { %337 = vmatmul.f32.gmra.mxu3 %v111_v59  ;;  %v559_v59 = vld [vmem:[#allocation11 + $0x178] sm:$0xff] }
  0x6c   :  { %713 = vmatpush.msra.mxu3 %v559_v59 }
  0x6e   :  { %714 = vmatpush.msra.mxu3 %v557_v63 }
  0x70   :  { %715 = vmatpush.msra.mxu3 %v555_v2 }
  0x71   :  { %299 = vmatmul.f32.gmra.mxu2 %v112_v3  ;;  %v560_v3 = vld [vmem:[#allocation11 + $0x180] sm:$0xff] }
  0x72   :  { %716 = vmatpush.msra.mxu3 %v553_v6 }
  0x73   :  { %340 = vmatmul.f32.gmra.mxu3 %v113_v7  ;;  %v556_v7 = vld [vmem:[#allocation11 + $0x160] sm:$0xff] }
  0x74   :  { %717 = vmatpush.msra.mxu3 %v551_v12 }
  0x76   :  { %718 = vmatpush.msra.mxu3 %v549_v15 }
  0x78   :  { %719 = vmatpush.msra.mxu3 %v547_v23 }
  0x79   :  { %302 = vmatmul.f32.gmra.mxu2 %v1525_v32  ;;  %v529_v32 = vld [vmem:[#allocation11 + $0x88] sm:$0xff] }
  0x7a   :  { %671 = vmatpush.msra.mxu2 %v529_v32  ;;  %720 = vmatpush.msra.mxu3 %v545_v28 }
  0x7b   :  { %343 = vmatmul.f32.gmra.mxu3 %v1531_v36  ;;  %v524_v36 = vld [vmem:[#allocation11 + $0x60] sm:$0xff] }
  0x7c   :  { %672 = vmatpush.msra.mxu2 %v527_v38  ;;  %591 = vmatpush.msrb.mxu0 %v524_v36 }
  0x7e   :  { %673 = vmatpush.msra.mxu2 %v525_v39  ;;  %592 = vmatpush.msrb.mxu0 %v522_v40 }
  0x80   :  { %674 = vmatpush.msra.mxu2 %v523_v41  ;;  %593 = vmatpush.msrb.mxu0 %v520_v43 }
  0x81   :  { %305 = vmatmul.f32.gmra.mxu2 %v1537_v44  ;;  %v521_v44 = vld [vmem:[#allocation11 + $0x48] sm:$0xff] }
  0x82   :  { %675 = vmatpush.msra.mxu2 %v521_v44  ;;  %594 = vmatpush.msrb.mxu0 %v518_v45 }
  0x83   :  { %346 = vmatmul.f32.gmra.mxu3 %v1542_v48  ;;  %v517_v48 = vld [vmem:[#allocation11 + $0x28] sm:$0xff] }
  0x84   :  { %676 = vmatpush.msra.mxu2 %v519_v46  ;;  %595 = vmatpush.msrb.mxu0 %v516_v47 }
  0x86   :  { %677 = vmatpush.msra.mxu2 %v517_v48  ;;  %596 = vmatpush.msrb.mxu0 %v514_v50 }
  0x88   :  { %678 = vmatpush.msra.mxu2 %v515_v51  ;;  %597 = vmatpush.msrb.mxu0 %v512_v52 }
  0x89   :  { %308 = vmatmul.f32.gmra.mxu2 %v1547_v56  ;;  %v572_v56 = vld [vmem:[#allocation11 + $0x1e0] sm:$0xff] }
  0x8a   :  { %679 = vmatpush.msra.mxu2 %v513_v53  ;;  %624 = vmatpush.msrb.mxu1 %v572_v56 }
  0x8b   :  { %349 = vmatmul.f32.gmra.mxu3 %v1549_v60  ;;  %v568_v60 = vld [vmem:[#allocation11 + $0x1c0] sm:$0xff] }
  0x8c   :  { %625 = vmatpush.msrb.mxu1 %v570_v58 }
  0x8e   :  { %626 = vmatpush.msrb.mxu1 %v568_v60 }
  0x90   :  { %627 = vmatpush.msrb.mxu1 %v566_v61  ;;  %v1598_v61 = vperm.slane %v1571_v1, 1 }
  0x91   :  { %311 = vmatmul.f32.gmra.mxu2 %v1553_v4  ;;  %v1574_v4 = vperm.slane %v1571_v1, 0 }
  0x92   :  { %628 = vmatpush.msrb.mxu1 %v564_v62 }
  0x93   :  { %352 = vmatmul.f32.gmra.mxu3 %v1555_v8 }
  0x94   :  { %629 = vmatpush.msrb.mxu1 %v562_v0 }
  0x96   :  { %630 = vmatpush.msrb.mxu1 %v560_v3 }
  0x98   :  { %631 = vmatpush.msrb.mxu1 %v558_v5 }
  0x9a   :  { %632 = vmatpush.msrb.mxu1 %v556_v7 }
  0x9c   :  { %633 = vmatpush.msrb.mxu1 %v554_v10 }
  0x9e   :  { %634 = vmatpush.msrb.mxu1 %v552_v14 }
  0xa0   :  { %635 = vmatpush.msrb.mxu1 %v550_v16 }
  0xa2   :  { %636 = vmatpush.msrb.mxu1 %v548_v19 }
  0xa4   :  { %637 = vmatpush.msrb.mxu1 %v546_v24 }
  0xa6   :  { %638 = vmatpush.msrb.mxu1 %v544_v27 }
  0xb5   :  { %v209_v8 = vpop.f32.mrf.mxu0 }
  0xb6   :  { %v210_v9 = vadd.f32 %v209_v8, %v1574_v4 }
  0xb7   :  { %v250_v11 = vpop.f32.mrf.mxu1 }
  0xb8   :  { %v251_v13 = vadd.f32 %v250_v11, %v210_v9 }
  0xba   :  { %vm376_vm0 = vcmp.gt.f32.partialorder %v251_v13, 1.0  ;;  %v386_v25 = vmul.f32 0.9, %v251_v13 }
  0xbb   :  { %v221_v17 = vpop.f32.mrf.mxu2  ;;  %1175 = vmatmul.msk.f32.vlgmr.msrb.gmra.mxu0 %vm376_vm0, %v1456_v18  ;;  %1191 = vmatmul.msk.f32.vlgmr.msra.gmra.mxu2 %vm376_vm0, %v1456_v18  ;;  %v1135_v31 = vsel %vm376_vm0, 1.0, %v1457_v30 }
  0xbc   :  { %v222_v52 = vadd.f32 %v221_v17, %v1574_v4 }
  0xbd   :  { %v212_v20 = vpop.f32.mrf.mxu0 }
  0xbe   :  { %v213_v21 = vadd.f32 %v212_v20, %v1574_v4  ;;  %v262_v22 = vpop.f32.mrf.mxu3 }
  0xbf   :  { %v263_v57 = vadd.f32 %v262_v22, %v222_v52  ;;  %v916_v52 = vld [vmem:[#allocation13 + $0x70] sm:$0xff] }
  0xc0   :  { %v253_v26 = vpop.f32.mrf.mxu1 }
  0xc1   :  { %v254_v29 = vadd.f32 %v253_v26, %v213_v21 }
  0xc3   :  { %v388_v33 = vadd.f32 %v386_v25, %v254_v29 }
  0xc4   :  { %v224_v34 = vpop.f32.mrf.mxu2 }
  0xc5   :  { %v390_v35 = vsub.f32 %v388_v33, %v1135_v31  ;;  %v225_v60 = vadd.f32 %v224_v34, %v1574_v4 }
  0xc6   :  { %v215_v32 = vpop.f32.mrf.mxu0  ;;  %v265_v37 = vpop.f32.mrf.mxu3 }
  0xc7   :  { %v216_v38 = vadd.f32 %v215_v32, %v1574_v4  ;;  %v402_v36 = vmul.f32 0.9, %v390_v35  ;;  %vm392_vm1 = vcmp.gt.f32.partialorder %v390_v35, 1.0  ;;  %v266_v2 = vadd.f32 %v265_v37, %v225_v60  ;;  %v914_v60 = vld [vmem:[#allocation13 + $0x60] sm:$0xff] }
  0xc8   :  { %v256_v39 = vpop.f32.mrf.mxu1  ;;  %1176 = vmatmul.msk.f32.gmra.mxu0 %vm392_vm1, %v1456_v18  ;;  %1192 = vmatmul.msk.f32.gmra.mxu2 %vm392_vm1, %v1456_v18  ;;  %v1137_v41 = vsel %vm392_vm1, 1.0, %v1457_v30 }
  0xc9   :  { %v257_v40 = vadd.f32 %v256_v39, %v216_v38 }
  0xcb   :  { %v404_v42 = vadd.f32 %v402_v36, %v257_v40 }
  0xcc   :  { %v227_v43 = vpop.f32.mrf.mxu2 }
  0xcd   :  { %v406_v44 = vsub.f32 %v404_v42, %v1137_v41  ;;  %v228_v7 = vadd.f32 %v227_v43, %v1574_v4 }
  0xce   :  { %v218_v45 = vpop.f32.mrf.mxu0  ;;  %v268_v46 = vpop.f32.mrf.mxu3 }
  0xcf   :  { %v219_v47 = vadd.f32 %v218_v45, %v1574_v4  ;;  %v418_v48 = vmul.f32 0.9, %v406_v44  ;;  %vm408_vm2 = vcmp.gt.f32.partialorder %v406_v44, 1.0  ;;  %v269_v11 = vadd.f32 %v268_v46, %v228_v7 }
  0xd0   :  { %v259_v49 = vpop.f32.mrf.mxu1  ;;  %1177 = vmatmul.msk.f32.gmra.mxu0 %vm408_vm2, %v1456_v18  ;;  %1193 = vmatmul.msk.f32.gmra.mxu2 %vm408_vm2, %v1456_v18  ;;  %v1139_v51 = vsel %vm408_vm2, 1.0, %v1457_v30 }
  0xd1   :  { %v260_v50 = vadd.f32 %v259_v49, %v219_v47 }
  0xd3   :  { %v420_v53 = vadd.f32 %v418_v48, %v260_v50  ;;  %v917_v50 = vld [vmem:[#allocation13 + $0x78] sm:$0xff] }
  0xd4   :  { %v230_v54 = vpop.f32.mrf.mxu2  ;;  %938 = vmatpush.msra.mxu0 %v917_v50  ;;  %v576_v50 = vld [vmem:[%s1742_s4] sm:$0x3] }
  0xd5   :  { %v422_v55 = vsub.f32 %v420_v53, %v1139_v51  ;;  %v231_v22 = vadd.f32 %v230_v54, %v1574_v4  ;;  %v933_v51 = vld [vmem:[#allocation13 + $0xf8] sm:$0xff] }
  0xd6   :  { %v271_v56 = vpop.f32.mrf.mxu3  ;;  %979 = vmatpush.msra.mxu1 %v933_v51  ;;  %939 = vmatpush.msra.mxu0 %v916_v52  ;;  %v1653_v52 = vperm.slane %v576_v50, 0 }
  0xd7   :  { %vm424_vm3 = vcmp.gt.f32.partialorder %v422_v55, 1.0  ;;  %v434_v58 = vmul.f32 0.9, %v422_v55  ;;  %v272_v28 = vadd.f32 %v271_v56, %v231_v22  ;;  %v932_v55 = vld [vmem:[#allocation13 + $0xf0] sm:$0xff]  ;;  %v915_v56 = vld [vmem:[#allocation13 + $0x68] sm:$0xff] }
  0xd8   :  { %v1141_v59 = vsel %vm424_vm3, 1.0, %v1457_v30  ;;  %1178 = vmatmul.msk.f32.gmra.mxu0 %vm424_vm3, %v1456_v18  ;;  %1194 = vmatmul.msk.f32.gmra.mxu2 %vm424_vm3, %v1456_v18 }
  0xd9   :  { %v436_v62 = vadd.f32 %v434_v58, %v263_v57  ;;  %v931_v57 = vld [vmem:[#allocation13 + $0xe8] sm:$0xff]  ;;  %980 = vmatpush.msra.mxu1 %v932_v55  ;;  %940 = vmatpush.msra.mxu0 %v915_v56  ;;  %v1656_v55 = vperm.slane %v576_v50, 1 }
  0xdb   :  { %v438_v63 = vsub.f32 %v436_v62, %v1141_v59  ;;  %981 = vmatpush.msra.mxu1 %v931_v57  ;;  %941 = vmatpush.msra.mxu0 %v914_v60 }
  0xdc   :  { %v291_v0 = vpop.f32.mrf.mxu2 }
  0xdd   :  { %v292_v3 = vadd.f32 %v291_v0, %v1598_v61  ;;  %vm440_vm4 = vcmp.gt.f32.partialorder %v438_v63, 1.0  ;;  %v450_v5 = vmul.f32 0.9, %v438_v63 }
  0xde   :  { %v332_v6 = vpop.f32.mrf.mxu3  ;;  %v1143_v10 = vsel %vm440_vm4, 1.0, %v1457_v30 }
  0xdf   :  { %v333_v8 = vadd.f32 %v332_v6, %v292_v3  ;;  %v452_v9 = vadd.f32 %v450_v5, %v266_v2 }
  0xe0   :  { %1179 = vmatmul.msk.f32.gmra.mxu0 %vm440_vm4, %v1456_v18  ;;  %1195 = vmatmul.msk.f32.gmra.mxu2 %vm440_vm4, %v1456_v18 }
  0xe1   :  { %vm377_vm5 = vcmp.gt.f32.partialorder %v333_v8, 1.0  ;;  %v454_v1 = vsub.f32 %v452_v9, %v1143_v10  ;;  %v387_v19 = vmul.f32 0.9, %v333_v8 }
  0xe2   :  { %1183 = vmatmul.msk.f32.vlgmr.msrb.gmra.mxu1 %vm377_vm5, %v1456_v18  ;;  %1199 = vmatmul.msk.f32.vlgmr.msra.gmra.mxu3 %vm377_vm5, %v1456_v18  ;;  %v1136_v24 = vsel %vm377_vm5, 1.0, %v1457_v30 }
  0xe3   :  { %vm456_vm6 = vcmp.gt.f32.partialorder %v454_v1, 1.0  ;;  %v466_v12 = vmul.f32 0.9, %v454_v1 }
  0xe4   :  { %v294_v13 = vpop.f32.mrf.mxu2  ;;  %v1145_v17 = vsel %vm456_vm6, 1.0, %v1457_v30 }
  0xe5   :  { %v295_v14 = vadd.f32 %v294_v13, %v1598_v61  ;;  %v468_v15 = vadd.f32 %v466_v12, %v269_v11 }
  0xe6   :  { %v335_v16 = vpop.f32.mrf.mxu3 }
  0xe7   :  { %v336_v20 = vadd.f32 %v335_v16, %v295_v14  ;;  %v470_v21 = vsub.f32 %v468_v15, %v1145_v17 }
  0xe8   :  { %1180 = vmatmul.msk.f32.gmra.mxu0 %vm456_vm6, %v1456_v18  ;;  %1196 = vmatmul.msk.f32.gmra.mxu2 %vm456_vm6, %v1456_v18 }
  0xe9   :  { %v389_v23 = vadd.f32 %v387_v19, %v336_v20  ;;  %v482_v26 = vmul.f32 0.9, %v470_v21  ;;  %vm472_vm8 = vcmp.gt.f32.partialorder %v470_v21, 1.0 }
  0xea   :  { %v1147_v37 = vsel %vm472_vm8, 1.0, %v1457_v30 }
  0xeb   :  { %v391_v25 = vsub.f32 %v389_v23, %v1136_v24  ;;  %v484_v4 = vadd.f32 %v482_v26, %v272_v28  ;;  %v930_v23 = vld [vmem:[#allocation13 + $0xe0] sm:$0xff]  ;;  %v913_v24 = vld [vmem:[#allocation13 + $0x58] sm:$0xff]  ;;  %v928_v28 = vld [vmem:[#allocation13 + $0xd0] sm:$0xff] }
  0xec   :  { %v297_v27 = vpop.f32.mrf.mxu2  ;;  %982 = vmatpush.msra.mxu1 %v930_v23  ;;  %942 = vmatpush.msra.mxu0 %v913_v24 }
  0xed   :  { %v298_v29 = vadd.f32 %v297_v27, %v1598_v61  ;;  %vm393_vm7 = vcmp.gt.f32.partialorder %v391_v25, 1.0  ;;  %v403_v34 = vmul.f32 0.9, %v391_v25  ;;  %v486_v36 = vsub.f32 %v484_v4, %v1147_v37  ;;  %v929_v25 = vld [vmem:[#allocation13 + $0xd8] sm:$0xff]  ;;  %v924_v37 = vld [vmem:[#allocation13 + $0xb0] sm:$0xff] }
  0xee   :  { %v338_v31 = vpop.f32.mrf.mxu3  ;;  %1184 = vmatmul.msk.f32.gmra.mxu1 %vm393_vm7, %v1456_v18  ;;  %1200 = vmatmul.msk.f32.gmra.mxu3 %vm393_vm7, %v1456_v18  ;;  %v1138_v32 = vsel %vm393_vm7, 1.0, %v1457_v30  ;;  %v909_v4 = vld [vmem:[#allocation13 + $0x38] sm:$0xff] }
  0xef   :  { %v339_v33 = vadd.f32 %v338_v31, %v298_v29  ;;  %vm488_vm10 = vcmp.gt.f32.partialorder %v486_v36, 1.0  ;;  %983 = vmatpush.msra.mxu1 %v929_v25  ;;  %v911_v29 = vld [vmem:[#allocation13 + $0x48] sm:$0xff] }
  0xf0   :  { %1181 = vmatmul.msk.f32.gmra.mxu0 %vm472_vm8, %v1456_v18  ;;  %1197 = vmatmul.msk.f32.gmra.mxu2 %vm472_vm8, %v1456_v18  ;;  %v927_v31 = vld [vmem:[#allocation13 + $0xc8] sm:$0xff] }
  0xf1   :  { %v405_v35 = vadd.f32 %v403_v34, %v339_v33  ;;  %984 = vmatpush.msra.mxu1 %v928_v28  ;;  %v910_v33 = vld [vmem:[#allocation13 + $0x40] sm:$0xff]  ;;  %v923_v36 = vld [vmem:[#allocation13 + $0xa8] sm:$0xff] }
  0xf2   :  { %v926_v34 = vld [vmem:[#allocation13 + $0xc0] sm:$0xff] }
  0xf3   :  { %v407_v38 = vsub.f32 %v405_v35, %v1138_v32  ;;  %985 = vmatpush.msra.mxu1 %v927_v31  ;;  %v925_v35 = vld [vmem:[#allocation13 + $0xb8] sm:$0xff]  ;;  %v908_v32 = vld [vmem:[#allocation13 + $0x30] sm:$0xff] }
  0xf4   :  { %v300_v39 = vpop.f32.mrf.mxu2 }
  0xf5   :  { %v301_v40 = vadd.f32 %v300_v39, %v1598_v61  ;;  %vm409_vm9 = vcmp.gt.f32.partialorder %v407_v38, 1.0  ;;  %v419_v43 = vmul.f32 0.9, %v407_v38  ;;  %986 = vmatpush.msra.mxu1 %v926_v34  ;;  %v907_v38 = vld [vmem:[#allocation13 + $0x28] sm:$0xff]  ;;  %v906_v39 = vld [vmem:[#allocation13 + $0x20] sm:$0xff] }
  0xf6   :  { %v341_v41 = vpop.f32.mrf.mxu3  ;;  %1185 = vmatmul.msk.f32.gmra.mxu1 %vm409_vm9, %v1456_v18  ;;  %1201 = vmatmul.msk.f32.gmra.mxu3 %vm409_vm9, %v1456_v18  ;;  %v1140_v45 = vsel %vm409_vm9, 1.0, %v1457_v30 }
  0xf7   :  { %v342_v42 = vadd.f32 %v341_v41, %v301_v40  ;;  %987 = vmatpush.msra.mxu1 %v925_v35  ;;  %v905_v40 = vld [vmem:[#allocation13 + $0x18] sm:$0xff]  ;;  %v904_v41 = vld [vmem:[#allocation13 + $0x10] sm:$0xff] }
  0xf8   :  { %1182 = vmatmul.msk.f32.gmra.mxu0 %vm488_vm10, %v1456_v18  ;;  %1198 = vmatmul.msk.f32.gmra.mxu2 %vm488_vm10, %v1456_v18 }
  0xf9   :  { %v421_v44 = vadd.f32 %v419_v43, %v342_v42  ;;  %988 = vmatpush.msra.mxu1 %v924_v37  ;;  %v922_v42 = vld [vmem:[#allocation13 + $0xa0] sm:$0xff]  ;;  %v903_v43 = vld [vmem:[#allocation13 + $0x8] sm:$0xff] }
  0xfb   :  { %v423_v46 = vsub.f32 %v421_v44, %v1140_v45  ;;  %989 = vmatpush.msra.mxu1 %v923_v36  ;;  %v921_v44 = vld [vmem:[#allocation13 + $0x98] sm:$0xff]  ;;  %v902_v45 = vld [vmem:[#allocation13] sm:$0xff] }
  0xfc   :  { %v303_v47 = vpop.f32.mrf.mxu2 }
  0xfd   :  { %v304_v48 = vadd.f32 %v303_v47, %v1598_v61  ;;  %vm425_vm11 = vcmp.gt.f32.partialorder %v423_v46, 1.0  ;;  %v435_v54 = vmul.f32 0.9, %v423_v46  ;;  %990 = vmatpush.msra.mxu1 %v922_v42  ;;  %v920_v46 = vld [vmem:[#allocation13 + $0x90] sm:$0xff]  ;;  %v919_v47 = vld [vmem:[#allocation13 + $0x88] sm:$0xff] }
  0xfe   :  { %v344_v49 = vpop.f32.mrf.mxu3  ;;  %1186 = vmatmul.msk.f32.gmra.mxu1 %vm425_vm11, %v1456_v18  ;;  %1202 = vmatmul.msk.f32.gmra.mxu3 %vm425_vm11, %v1456_v18  ;;  %v1142_v59 = vsel %vm425_vm11, 1.0, %v1457_v30 }
  0xff   :  { %v345_v53 = vadd.f32 %v344_v49, %v304_v48  ;;  %991 = vmatpush.msra.mxu1 %v921_v44  ;;  %v918_v48 = vld [vmem:[#allocation13 + $0x80] sm:$0xff] }
 0x101   :  { %v437_v58 = vadd.f32 %v435_v54, %v345_v53  ;;  %992 = vmatpush.msra.mxu1 %v920_v46 }
 0x103   :  { %v439_v62 = vsub.f32 %v437_v58, %v1142_v59  ;;  %993 = vmatpush.msra.mxu1 %v919_v47 }
 0x104   :  { %v306_v63 = vpop.f32.mrf.mxu2 }
 0x105   :  { %v307_v0 = vadd.f32 %v306_v63, %v1598_v61  ;;  %vm441_vm12 = vcmp.gt.f32.partialorder %v439_v62, 1.0  ;;  %v451_v5 = vmul.f32 0.9, %v439_v62  ;;  %994 = vmatpush.msra.mxu1 %v918_v48 }
 0x106   :  { %v347_v2 = vpop.f32.mrf.mxu3  ;;  %1187 = vmatmul.msk.f32.gmra.mxu1 %vm441_vm12, %v1456_v18  ;;  %1203 = vmatmul.msk.f32.gmra.mxu3 %vm441_vm12, %v1456_v18  ;;  %v1144_v7 = vsel %vm441_vm12, 1.0, %v1457_v30 }
 0x107   :  { %v348_v3 = vadd.f32 %v347_v2, %v307_v0 }
 0x109   :  { %v453_v6 = vadd.f32 %v451_v5, %v348_v3 }
 0x10b   :  { %v455_v8 = vsub.f32 %v453_v6, %v1144_v7 }
 0x10c   :  { %v309_v9 = vpop.f32.mrf.mxu2 }
 0x10d   :  { %v310_v10 = vadd.f32 %v309_v9, %v1598_v61  ;;  %vm457_vm13 = vcmp.gt.f32.partialorder %v455_v8, 1.0  ;;  %v467_v12 = vmul.f32 0.9, %v455_v8 }
 0x10e   :  { %v350_v1 = vpop.f32.mrf.mxu3  ;;  %1188 = vmatmul.msk.f32.gmra.mxu1 %vm457_vm13, %v1456_v18  ;;  %1204 = vmatmul.msk.f32.gmra.mxu3 %vm457_vm13, %v1456_v18  ;;  %v1146_v14 = vsel %vm457_vm13, 1.0, %v1457_v30 }
 0x10f   :  { %v351_v11 = vadd.f32 %v350_v1, %v310_v10 }
 0x111   :  { %v469_v13 = vadd.f32 %v467_v12, %v351_v11 }
 0x113   :  { %v471_v15 = vsub.f32 %v469_v13, %v1146_v14 }
 0x114   :  { %v312_v16 = vpop.f32.mrf.mxu2 }
 0x115   :  { %v313_v17 = vadd.f32 %v312_v16, %v1598_v61  ;;  %vm473_vm14 = vcmp.gt.f32.partialorder %v471_v15, 1.0  ;;  %v483_v21 = vmul.f32 0.9, %v471_v15  ;;  %v912_v61 = vld [vmem:[#allocation13 + $0x50] sm:$0xff] }
 0x116   :  { %v353_v19 = vpop.f32.mrf.mxu3  ;;  %1189 = vmatmul.msk.f32.gmra.mxu1 %vm473_vm14, %v1456_v18  ;;  %1205 = vmatmul.msk.f32.gmra.mxu3 %vm473_vm14, %v1456_v18  ;;  %v1148_v26 = vsel %vm473_vm14, 1.0, %v1457_v30 }
 0x117   :  { %v354_v20 = vadd.f32 %v353_v19, %v313_v17  ;;  %943 = vmatpush.msra.mxu0 %v912_v61 }
 0x119   :  { %v485_v22 = vadd.f32 %v483_v21, %v354_v20  ;;  %944 = vmatpush.msra.mxu0 %v911_v29 }
 0x11b   :  { %v487_v27 = vsub.f32 %v485_v22, %v1148_v26  ;;  %945 = vmatpush.msra.mxu0 %v910_v33 }
 0x11d   :  { %vm489_vm15 = vcmp.gt.f32.partialorder %v487_v27, 1.0  ;;  %946 = vmatpush.msra.mxu0 %v909_v4 }
 0x11e   :  { %1190 = vmatmul.msk.f32.gmra.mxu1 %vm489_vm15, %v1456_v18  ;;  %1206 = vmatmul.msk.f32.gmra.mxu3 %vm489_vm15, %v1456_v18 }
 0x11f   :  { %947 = vmatpush.msra.mxu0 %v908_v32 }
 0x121   :  { %948 = vmatpush.msra.mxu0 %v907_v38 }
 0x123   :  { %949 = vmatpush.msra.mxu0 %v906_v39 }
 0x125   :  { %950 = vmatpush.msra.mxu0 %v905_v40 }
 0x127   :  { %951 = vmatpush.msra.mxu0 %v904_v41 }
 0x129   :  { %952 = vmatpush.msra.mxu0 %v903_v43 }
 0x12b   :  { %953 = vmatpush.msra.mxu0 %v902_v45 }
 0x138   :  { %v599_v49 = vpop.f32.mrf.mxu0 }
 0x139   :  { %v600_v54 = vadd.f32 %v599_v49, %v1653_v52 }
 0x13e   :  { %v681_v51 = vpop.f32.mrf.mxu2 }
 0x13f   :  { %v682_v59 = vadd.f32 %v681_v51, %v1656_v55 }
 0x145   :  { %v602_v53 = vpop.f32.mrf.mxu0 }
 0x146   :  { %v603_v0 = vadd.f32 %v602_v53, %v1653_v52 }
 0x14b   :  { %v684_v58 = vpop.f32.mrf.mxu2 }
 0x14c   :  { %v685_v10 = vadd.f32 %v684_v58, %v1656_v55 }
 0x14d   :  { %v605_v60 = vpop.f32.mrf.mxu0 }
 0x14e   :  { %v606_v12 = vadd.f32 %v605_v60, %v1653_v52 }
 0x153   :  { %v687_v2 = vpop.f32.mrf.mxu2 }
 0x154   :  { %v688_v25 = vadd.f32 %v687_v2, %v1656_v55 }
 0x155   :  { %v608_v8 = vpop.f32.mrf.mxu0 }
 0x156   :  { %v609_v28 = vadd.f32 %v608_v8, %v1653_v52 }
 0x15b   :  { %v690_v20 = vpop.f32.mrf.mxu2 }
 0x15c   :  { %v691_v40 = vadd.f32 %v690_v20, %v1656_v55 }
 0x15d   :  { %v611_v27 = vpop.f32.mrf.mxu0 }
 0x15e   :  { %v612_v43 = vadd.f32 %v611_v27, %v1653_v52 }
 0x15f   :  { %v640_v56 = vpop.f32.mrf.mxu1 }
 0x160   :  { %v641_v57 = vadd.f32 %v640_v56, %v600_v54 }
 0x162   :  { %vm766_vm0 = vcmp.gt.f32.partialorder %v641_v57, 1.0  ;;  %v776_v5 = vmul.f32 0.9, %v641_v57 }
 0x163   :  { %1207 = vmatmul.msk.f32.vlgmr.msra.gmra.mxu0 %vm766_vm0, %v1456_v18  ;;  %v1151_v9 = vsel %vm766_vm0, 1.0, %v1457_v30  ;;  %v693_v36 = vpop.f32.mrf.mxu2 }
 0x164   :  { %v694_v57 = vadd.f32 %v693_v36, %v1656_v55 }
 0x165   :  { %v722_v62 = vpop.f32.mrf.mxu3  ;;  %v614_v46 = vpop.f32.mrf.mxu0 }
 0x166   :  { %v723_v63 = vadd.f32 %v722_v62, %v682_v59  ;;  %v615_v62 = vadd.f32 %v614_v46, %v1653_v52 }
 0x168   :  { %vm767_vm1 = vcmp.gt.f32.partialorder %v723_v63, 1.0  ;;  %v777_v13 = vmul.f32 0.9, %v723_v63 }
 0x169   :  { %1215 = vmatmul.msk.f32.vlgmr.msra.gmra.mxu1 %vm767_vm1, %v1456_v18  ;;  %v1152_v21 = vsel %vm767_vm1, 1.0, %v1457_v30 }
 0x16b   :  { %v643_v3 = vpop.f32.mrf.mxu1  ;;  %v696_v59 = vpop.f32.mrf.mxu2 }
 0x16c   :  { %v644_v6 = vadd.f32 %v643_v3, %v603_v0 }
 0x16e   :  { %v778_v7 = vadd.f32 %v776_v5, %v644_v6 }
 0x170   :  { %v780_v1 = vsub.f32 %v778_v7, %v1151_v9  ;;  %v617_v7 = vpop.f32.mrf.mxu0 }
 0x171   :  { %v725_v11 = vpop.f32.mrf.mxu3 }
 0x172   :  { %v726_v14 = vadd.f32 %v725_v11, %v685_v10  ;;  %vm782_vm2 = vcmp.gt.f32.partialorder %v780_v1, 1.0  ;;  %v792_v19 = vmul.f32 0.9, %v780_v1  ;;  %v697_v11 = vadd.f32 %v696_v59, %v1656_v55 }
 0x173   :  { %v646_v15 = vpop.f32.mrf.mxu1  ;;  %1208 = vmatmul.msk.f32.gmra.mxu0 %vm782_vm2, %v1456_v18  ;;  %v1153_v24 = vsel %vm782_vm2, 1.0, %v1457_v30 }
 0x174   :  { %v779_v16 = vadd.f32 %v777_v13, %v726_v14  ;;  %v647_v17 = vadd.f32 %v646_v15, %v606_v12  ;;  %v618_v14 = vadd.f32 %v617_v7, %v1653_v52 }
 0x176   :  { %v781_v22 = vsub.f32 %v779_v16, %v1152_v21  ;;  %v794_v23 = vadd.f32 %v792_v19, %v647_v17  ;;  %v699_v17 = vpop.f32.mrf.mxu2 }
 0x178   :  { %v796_v26 = vsub.f32 %v794_v23, %v1153_v24  ;;  %vm783_vm3 = vcmp.gt.f32.partialorder %v781_v22, 1.0  ;;  %v793_v31 = vmul.f32 0.9, %v781_v22 }
 0x179   :  { %v728_v61 = vpop.f32.mrf.mxu3  ;;  %1216 = vmatmul.msk.f32.gmra.mxu1 %vm783_vm3, %v1456_v18  ;;  %v1154_v32 = vsel %vm783_vm3, 1.0, %v1457_v30 }
 0x17a   :  { %v729_v29 = vadd.f32 %v728_v61, %v688_v25  ;;  %vm798_vm4 = vcmp.gt.f32.partialorder %v796_v26, 1.0  ;;  %v808_v35 = vmul.f32 0.9, %v796_v26  ;;  %v620_v26 = vpop.f32.mrf.mxu0  ;;  %v700_v61 = vadd.f32 %v699_v17, %v1656_v55 }
 0x17b   :  { %v649_v33 = vpop.f32.mrf.mxu1  ;;  %1209 = vmatmul.msk.f32.gmra.mxu0 %vm798_vm4, %v1456_v18  ;;  %v1155_v39 = vsel %vm798_vm4, 1.0, %v1457_v30 }
 0x17c   :  { %v795_v34 = vadd.f32 %v793_v31, %v729_v29  ;;  %v650_v4 = vadd.f32 %v649_v33, %v609_v28  ;;  %v621_v31 = vadd.f32 %v620_v26, %v1653_v52 }
 0x17e   :  { %v797_v37 = vsub.f32 %v795_v34, %v1154_v32  ;;  %v810_v38 = vadd.f32 %v808_v35, %v650_v4 }
 0x180   :  { %v812_v41 = vsub.f32 %v810_v38, %v1155_v39  ;;  %vm799_vm5 = vcmp.gt.f32.partialorder %v797_v37, 1.0  ;;  %v809_v45 = vmul.f32 0.9, %v797_v37  ;;  %v702_v38 = vpop.f32.mrf.mxu2 }
 0x181   :  { %v731_v42 = vpop.f32.mrf.mxu3  ;;  %1217 = vmatmul.msk.f32.gmra.mxu1 %vm799_vm5, %v1456_v18  ;;  %v1156_v51 = vsel %vm799_vm5, 1.0, %v1457_v30 }
 0x182   :  { %v732_v44 = vadd.f32 %v731_v42, %v691_v40  ;;  %vm814_vm6 = vcmp.gt.f32.partialorder %v812_v41, 1.0  ;;  %v824_v50 = vmul.f32 0.9, %v812_v41  ;;  %v703_v42 = vadd.f32 %v702_v38, %v1656_v55  ;;  %v1708_v55 = vld [vmem:[%s1744_s6] ss:$0 sm:$0xff]  ;;  %s1458_s6 = smov [#allocation15]  }
 0x183   :  { %v652_v47 = vpop.f32.mrf.mxu1  ;;  %1210 = vmatmul.msk.f32.gmra.mxu0 %vm814_vm6, %v1456_v18  ;;  %v1157_v56 = vsel %vm814_vm6, 1.0, %v1457_v30  ;;  %s1113_s10 = sshll.u32 %s1458_s6, 4  ;;  %s1114_s10 = int_to_ptr.vmem [resolvable:$true] %s1113_s10 }
 0x184   :  { %v811_v48 = vadd.f32 %v809_v45, %v732_v44  ;;  %v653_v49 = vadd.f32 %v652_v47, %v612_v43 }
 0x186   :  { %v813_v53 = vsub.f32 %v811_v48, %v1156_v51  ;;  %v826_v54 = vadd.f32 %v824_v50, %v653_v49 }
 0x188   :  { %v828_v58 = vsub.f32 %v826_v54, %v1157_v56  ;;  %vm815_vm7 = vcmp.gt.f32.partialorder %v813_v53, 1.0  ;;  %v825_v0 = vmul.f32 0.9, %v813_v53 }
 0x189   :  { %v734_v60 = vpop.f32.mrf.mxu3  ;;  %1218 = vmatmul.msk.f32.gmra.mxu1 %vm815_vm7, %v1456_v18  ;;  %v1158_v8 = vsel %vm815_vm7, 1.0, %v1457_v30 }
 0x18a   :  { %v735_v63 = vadd.f32 %v734_v60, %v694_v57  ;;  %vm830_vm8 = vcmp.gt.f32.partialorder %v828_v58, 1.0  ;;  %v840_v6 = vmul.f32 0.9, %v828_v58 }
 0x18b   :  { %v655_v2 = vpop.f32.mrf.mxu1  ;;  %1211 = vmatmul.msk.f32.gmra.mxu0 %vm830_vm8, %v1456_v18  ;;  %v1159_v1 = vsel %vm830_vm8, 1.0, %v1457_v30 }
 0x18c   :  { %v827_v3 = vadd.f32 %v825_v0, %v735_v63  ;;  %v656_v5 = vadd.f32 %v655_v2, %v615_v62 }
 0x18e   :  { %v829_v9 = vsub.f32 %v827_v3, %v1158_v8  ;;  %v842_v10 = vadd.f32 %v840_v6, %v656_v5 }
 0x190   :  { %v844_v12 = vsub.f32 %v842_v10, %v1159_v1  ;;  %vm831_vm9 = vcmp.gt.f32.partialorder %v829_v9, 1.0  ;;  %v841_v16 = vmul.f32 0.9, %v829_v9 }
 0x191   :  { %v737_v13 = vpop.f32.mrf.mxu3  ;;  %1219 = vmatmul.msk.f32.gmra.mxu1 %vm831_vm9, %v1456_v18  ;;  %v1160_v23 = vsel %vm831_vm9, 1.0, %v1457_v30 }
 0x192   :  { %v738_v15 = vadd.f32 %v737_v13, %v697_v11  ;;  %vm846_vm10 = vcmp.gt.f32.partialorder %v844_v12, 1.0  ;;  %v856_v22 = vmul.f32 0.9, %v844_v12 }
 0x193   :  { %v658_v19 = vpop.f32.mrf.mxu1  ;;  %1212 = vmatmul.msk.f32.gmra.mxu0 %vm846_vm10, %v1456_v18  ;;  %v1161_v27 = vsel %vm846_vm10, 1.0, %v1457_v30 }
 0x194   :  { %v843_v20 = vadd.f32 %v841_v16, %v738_v15  ;;  %v659_v21 = vadd.f32 %v658_v19, %v618_v14 }
 0x196   :  { %v845_v24 = vsub.f32 %v843_v20, %v1160_v23  ;;  %v858_v25 = vadd.f32 %v856_v22, %v659_v21 }
 0x198   :  { %v860_v28 = vsub.f32 %v858_v25, %v1161_v27  ;;  %vm847_vm11 = vcmp.gt.f32.partialorder %v845_v24, 1.0  ;;  %v857_v34 = vmul.f32 0.9, %v845_v24 }
 0x199   :  { %v740_v29 = vpop.f32.mrf.mxu3  ;;  %1220 = vmatmul.msk.f32.gmra.mxu1 %vm847_vm11, %v1456_v18  ;;  %v1162_v36 = vsel %vm847_vm11, 1.0, %v1457_v30 }
 0x19a   :  { %v741_v33 = vadd.f32 %v740_v29, %v700_v61  ;;  %vm862_vm12 = vcmp.gt.f32.partialorder %v860_v28, 1.0  ;;  %v872_v37 = vmul.f32 0.9, %v860_v28 }
 0x19b   :  { %v661_v4 = vpop.f32.mrf.mxu1  ;;  %1213 = vmatmul.msk.f32.gmra.mxu0 %vm862_vm12, %v1456_v18  ;;  %v1163_v41 = vsel %vm862_vm12, 1.0, %v1457_v30 }
 0x19c   :  { %v859_v35 = vadd.f32 %v857_v34, %v741_v33  ;;  %v662_v32 = vadd.f32 %v661_v4, %v621_v31 }
 0x19e   :  { %v861_v39 = vsub.f32 %v859_v35, %v1162_v36  ;;  %v874_v40 = vadd.f32 %v872_v37, %v662_v32 }
 0x1a0   :  { %vm863_vm13 = vcmp.gt.f32.partialorder %v861_v39, 1.0  ;;  %v876_v52 = vsub.f32 %v874_v40, %v1163_v41  ;;  %v873_v45 = vmul.f32 0.9, %v861_v39 }
 0x1a1   :  { %v743_v43 = vpop.f32.mrf.mxu3  ;;  %1221 = vmatmul.msk.f32.gmra.mxu1 %vm863_vm13, %v1456_v18  ;;  %v1164_v47 = vsel %vm863_vm13, 1.0, %v1457_v30 }
 0x1a2   :  { %v744_v44 = vadd.f32 %v743_v43, %v703_v42  ;;  %vm878_vm14 = vcmp.gt.f32.partialorder %v876_v52, 1.0 }
 0x1a3   :  { %1214 = vmatmul.msk.f32.gmra.mxu0 %vm878_vm14, %v1456_v18 }
 0x1a4   :  { %v875_v46 = vadd.f32 %v873_v45, %v744_v44 }
 0x1a6   :  { %v877_v48 = vsub.f32 %v875_v46, %v1164_v47 }
 0x1a8   :  { %vm879_vm15 = vcmp.gt.f32.partialorder %v877_v48, 1.0 }
 0x1a9   :  { %1222 = vmatmul.msk.f32.gmra.mxu1 %vm879_vm15, %v1456_v18 }
 0x1e0   :  { %v955_v49 = vpop.f32.mrf.mxu0 }
 0x1e1   :  { %v956_v50 = vadd.f32 %v1708_v55, %v955_v49 }
 0x1e6   :  { %v996_v51 = vpop.f32.mrf.mxu1 }
 0x1e7   :  { %v997_v53 = vadd.f32 %v996_v51, %v956_v50 }
 0x1e9   :  { %vm1021_vm0 = vcmp.gt.f32.partialorder %v997_v53, 1.0  ;;  %1025 = vst [vmem:[#allocation15] sm:$0xff] %v997_v53  ;;  %v1026_v59 = vmul.f32 0.9, %v997_v53 }
 0x1ea   :  { %v1167_v54 = vsel %vm1021_vm0, 1.0, %v1457_v30 }
 0x1eb   :  { %1024 = vst [vmem:[#allocation14] sm:$0xff] %v1167_v54 }
 0x1f0   :  { %v958_v56 = vpop.f32.mrf.mxu0 }
 0x1f1   :  { %v959_v57 = vadd.f32 %v1708_v55, %v958_v56 }
 0x1f6   :  { %v999_v58 = vpop.f32.mrf.mxu1 }
 0x1f7   :  { %v1000_v18 = vadd.f32 %v999_v58, %v959_v57 }
 0x1f8   :  { %v961_v60 = vpop.f32.mrf.mxu0 }
 0x1f9   :  { %v1027_v62 = vadd.f32 %v1026_v59, %v1000_v18  ;;  %v962_v0 = vadd.f32 %v1708_v55, %v961_v60 }
 0x1fb   :  { %v1028_v63 = vsub.f32 %v1027_v62, %v1167_v54 }
 0x1fd   :  { %1035 = vst [vmem:[#allocation15 + $0x8] sm:$0xff] %v1028_v63  ;;  %vm1029_vm1 = vcmp.gt.f32.partialorder %v1028_v63, 1.0  ;;  %v1036_v6 = vmul.f32 0.9, %v1028_v63 }
 0x1fe   :  { %v1002_v2 = vpop.f32.mrf.mxu1  ;;  %v1168_v3 = vsel %vm1029_vm1, 1.0, %v1457_v30 }
 0x1ff   :  { %v1003_v5 = vadd.f32 %v1002_v2, %v962_v0  ;;  %1033 = vst [vmem:[#allocation14 + $0x8] sm:$0xff] %v1168_v3 }
 0x200   :  { %v964_v7 = vpop.f32.mrf.mxu0 }
 0x201   :  { %v1037_v8 = vadd.f32 %v1036_v6, %v1003_v5  ;;  %v965_v10 = vadd.f32 %v1708_v55, %v964_v7 }
 0x203   :  { %v1038_v9 = vsub.f32 %v1037_v8, %v1168_v3 }
 0x205   :  { %1045 = vst [vmem:[#allocation15 + $0x10] sm:$0xff] %v1038_v9  ;;  %vm1039_vm2 = vcmp.gt.f32.partialorder %v1038_v9, 1.0  ;;  %v1046_v13 = vmul.f32 0.9, %v1038_v9 }
 0x206   :  { %v1005_v1 = vpop.f32.mrf.mxu1  ;;  %v1169_v11 = vsel %vm1039_vm2, 1.0, %v1457_v30 }
 0x207   :  { %v1006_v12 = vadd.f32 %v1005_v1, %v965_v10  ;;  %1043 = vst [vmem:[#allocation14 + $0x10] sm:$0xff] %v1169_v11 }
 0x208   :  { %v967_v14 = vpop.f32.mrf.mxu0 }
 0x209   :  { %v1047_v15 = vadd.f32 %v1046_v13, %v1006_v12  ;;  %v968_v17 = vadd.f32 %v1708_v55, %v967_v14 }
 0x20b   :  { %v1048_v16 = vsub.f32 %v1047_v15, %v1169_v11 }
 0x20d   :  { %1055 = vst [vmem:[#allocation15 + $0x18] sm:$0xff] %v1048_v16  ;;  %vm1049_vm3 = vcmp.gt.f32.partialorder %v1048_v16, 1.0  ;;  %v1056_v22 = vmul.f32 0.9, %v1048_v16 }
 0x20e   :  { %v1008_v19 = vpop.f32.mrf.mxu1  ;;  %v1170_v20 = vsel %vm1049_vm3, 1.0, %v1457_v30 }
 0x20f   :  { %v1009_v21 = vadd.f32 %v1008_v19, %v968_v17  ;;  %1053 = vst [vmem:[#allocation14 + $0x18] sm:$0xff] %v1170_v20 }
 0x210   :  { %v970_v23 = vpop.f32.mrf.mxu0 }
 0x211   :  { %v1057_v24 = vadd.f32 %v1056_v22, %v1009_v21  ;;  %v971_v26 = vadd.f32 %v1708_v55, %v970_v23 }
 0x213   :  { %v1058_v25 = vsub.f32 %v1057_v24, %v1170_v20 }
 0x215   :  { %1065 = vst [vmem:[#allocation15 + $0x20] sm:$0xff] %v1058_v25  ;;  %vm1059_vm4 = vcmp.gt.f32.partialorder %v1058_v25, 1.0  ;;  %v1066_v29 = vmul.f32 0.9, %v1058_v25 }
 0x216   :  { %v1011_v27 = vpop.f32.mrf.mxu1  ;;  %v1171_v61 = vsel %vm1059_vm4, 1.0, %v1457_v30 }
 0x217   :  { %v1012_v28 = vadd.f32 %v1011_v27, %v971_v26  ;;  %1063 = vst [vmem:[#allocation14 + $0x20] sm:$0xff] %v1171_v61 }
 0x218   :  { %v973_v31 = vpop.f32.mrf.mxu0 }
 0x219   :  { %v1067_v33 = vadd.f32 %v1066_v29, %v1012_v28  ;;  %v974_v4 = vadd.f32 %v1708_v55, %v973_v31 }
 0x21b   :  { %v1068_v34 = vsub.f32 %v1067_v33, %v1171_v61 }
 0x21d   :  { %1075 = vst [vmem:[#allocation15 + $0x28] sm:$0xff] %v1068_v34  ;;  %vm1069_vm5 = vcmp.gt.f32.partialorder %v1068_v34, 1.0  ;;  %v1076_v38 = vmul.f32 0.9, %v1068_v34 }
 0x21e   :  { %v1014_v35 = vpop.f32.mrf.mxu1  ;;  %v1172_v32 = vsel %vm1069_vm5, 1.0, %v1457_v30 }
 0x21f   :  { %v1015_v37 = vadd.f32 %v1014_v35, %v974_v4  ;;  %1073 = vst [vmem:[#allocation14 + $0x28] sm:$0xff] %v1172_v32 }
 0x220   :  { %v976_v39 = vpop.f32.mrf.mxu0 }
 0x221   :  { %v1077_v36 = vadd.f32 %v1076_v38, %v1015_v37  ;;  %v977_v41 = vadd.f32 %v1708_v55, %v976_v39 }
 0x223   :  { %v1078_v40 = vsub.f32 %v1077_v36, %v1172_v32 }
 0x225   :  { %1085 = vst [vmem:[#allocation15 + $0x30] sm:$0xff] %v1078_v40  ;;  %vm1079_vm6 = vcmp.gt.f32.partialorder %v1078_v40, 1.0  ;;  %v1086_v44 = vmul.f32 0.9, %v1078_v40 }
 0x226   :  { %v1017_v42 = vpop.f32.mrf.mxu1  ;;  %v1173_v52 = vsel %vm1079_vm6, 1.0, %v1457_v30 }
 0x227   :  { %v1018_v43 = vadd.f32 %v1017_v42, %v977_v41  ;;  %1083 = vst [vmem:[#allocation14 + $0x30] sm:$0xff] %v1173_v52 }
 0x229   :  { %v1087_v45 = vadd.f32 %v1086_v44, %v1018_v43 }
 0x22b   :  { %v1088_v46 = vsub.f32 %v1087_v45, %v1173_v52 }
 0x22d   :  { %vm1089_vm7 = vcmp.gt.f32.partialorder %v1088_v46, 1.0  ;;  %1095 = vst [vmem:[#allocation15 + $0x38] sm:$0xff] %v1088_v46 }
 0x22e   :  { %v1174_v47 = vsel %vm1089_vm7, 1.0, %v1457_v30  ;;  %1121 = dma.vmem_to_hbm [thread:$0]  %s1114_s10, 1024, %s1116_s13, [#allocation16], %s1454_s29, %s1454_s29, %s1455_s30  }
 0x22f   :  { %1093 = vst [vmem:[#allocation14 + $0x38] sm:$0xff] %v1174_v47 }
 0x230   :  { %1108 = dma.vmem_to_hbm [thread:$0]  %s1101_s15, 1024, %s1103_s18, [#allocation7], %s1454_s29, %s1454_s29, %s1455_s30  }
 0x231   :  { %1443 = dma.done.wait [#allocation7], 1024  }
 0x232   :  { %1444 = vsyncadd [#allocation7], 4294966272 }
 0x233   :  { %1445 = dma.done.wait [#allocation16], 1024  }
 0x234   :  { %1446 = vsyncadd [#allocation16], 4294966272 }
 0x235   :  { %1130 = vsyncpa [#allocation6], 1 }
 0x236   :  { %1131 = vsyncpa [#allocation9], 1 }
 0x237   :  { %1132 = vsyncpa [#allocation12], 1 }
 0x238   :  { %1133 = vsyncpa [#allocation7], 1 }
 0x239   :  { %1134 = vsyncpa [#allocation16], 1 }

</bundles_post_ra>
